<compile_context>
chip_gen: v7x
topology: tpu7x:2x2x1
jax: 0.10.0
libtpu: 0.0.40
codegen_flags: <defaults>
</compile_context>

<pallas_src>
import functools
import math

import jax
import jax.numpy as jnp
from jax import lax
from jax.experimental import pallas as pl
from jax.experimental.pallas import tpu as pltpu


def lstm_forecast_kernel(x_ref, wih0_ref, whh_ref, *rest,
                         num_layers, hidden_dim, seq_len, output_dim):
    """Full LSTM (all layers, all timesteps) + final Linear for one batch block.

    x_ref       : (Bblk, T)          raw scalar-feature input (batch on sublanes)
    wih0_ref    : (1, 4H)            layer-0 input weight row (g-gate cols pre-scaled x2)
    whh_ref     : (L, H, 4H)         hidden->gates weights, transposed, per layer
    wih_rest_ref: (L-1, H, 4H)       input->gates weights for layers >= 1 (only if L > 1)
    b_ref       : (L, 1, 4H)         bias_ih + bias_hh per layer
    wfc_ref     : (1, H) if O==1 else (H, O)
    bfc_ref     : (1, O)
    out_ref     : (Bblk, O)
    """
    if num_layers > 1:
        wih_rest_ref, b_ref, wfc_ref, bfc_ref, out_ref = rest
    else:
        wih_rest_ref = None
        b_ref, wfc_ref, bfc_ref, out_ref = rest

    B = x_ref.shape[0]
    H = hidden_dim
    L = num_layers
    T = seq_len

    # ---- hoisted invariants (loaded / broadcast exactly once) ----
    lane = lax.broadcasted_iota(jnp.int32, (B, 4 * H), 1)
    g_mask = (lane >= 2 * H) & (lane < 3 * H)          # g-gate lanes (i, f, g, o order)

    def cell(gates, c_prev):
        # tanh(x) == 2*sigmoid(2x) - 1; the g-gate weight/bias columns were
        # pre-scaled by 2 in the wrapper, so ONE full-4H sigmoid EUP pass covers
        # all four gates; the correction is cheap VPU work.
        s = jax.nn.sigmoid(gates)
        act = jnp.where(g_mask, 2.0 * s - 1.0, s)
        # Static quarter-vreg lane slices of one (8,128) vreg; cheap at H=32.
        # TODO(synk): if a bundle dump shows relayout copies here, switch to a
        # pltpu.roll-based full-width alignment (XLU slot is otherwise idle).
        i = act[:, 0 * H:1 * H]
        f = act[:, 1 * H:2 * H]
        g = act[:, 2 * H:3 * H]
        o = act[:, 3 * H:4 * H]
        c = f * c_prev + i * g
        h = o * jnp.tanh(c)
        return h, c

    def run_layer(pre_list, whh_l):
        # pre_list[t]: (B, 4H) precomputed input-path gates (+bias) for step t.
        # The serial recurrence keeps only h @ W_hh (K=H) + cell math per step.
        h = jnp.zeros((B, H), jnp.float32)
        c = jnp.zeros((B, H), jnp.float32)
        hs = []
        # TODO(synk): for large T switch to lax.fori_loop(..., unroll=k) with the
        # hidden sequence written to a VMEM scratch; static unroll is fine at T=8.
        for t in range(T):
            gates = pre_list[t] + jnp.dot(h, whh_l,
                                          preferred_element_type=jnp.float32)
            h, c = cell(gates, c)
            hs.append(h)
        return hs

    # ---- layer 0: rank-1 input path + bias precomputed for all T (off the chain)
    wih0_row = wih0_ref[...]                           # (1, 4H)
    b0 = b_ref[0]                                      # (1, 4H)
    pre0 = [x_ref[:, t:t + 1] * wih0_row + b0 for t in range(T)]
    hs = run_layer(pre0, whh_ref[0])

    # ---- layers >= 1, layer-major (cuDNN-style): one batched input matmul per
    # layer over all T timesteps, then the cheap recurrence.
    for l in range(1, L):
        h_seq = jnp.concatenate(hs, axis=0)            # (T*B, H), sublane concat
        pre_flat = (jnp.dot(h_seq, wih_rest_ref[l - 1],
                            preferred_element_type=jnp.float32)
                    + b_ref[l])                        # (T*B, 4H)
        pre_list = [pre_flat[t * B:(t + 1) * B, :] for t in range(T)]
        hs = run_layer(pre_list, whh_ref[l])

    h_last = hs[-1]                                    # (B, H), last timestep, top layer

    # ---- final Linear.  For O==1 an (8,H)@(H,1) MXU call pays a full push/pop
    # for 8 useful values; use a VPU multiply + lane reduction instead.
    if output_dim == 1:
        out_ref[...] = (jnp.sum(h_last * wfc_ref[...], axis=-1, keepdims=True)
                        + bfc_ref[...])
    else:
        out_ref[...] = (jnp.dot(h_last, wfc_ref[...],
                                preferred_element_type=jnp.float32)
                        + bfc_ref[...])


def _scale_g_gate(a, hidden_dim):
    """Scale the g-gate block (last-axis cols 2H:3H) by 2 (exact, power of two)."""
    H = hidden_dim
    return a.at[..., 2 * H:3 * H].multiply(2.0)


def lstm_forecast(x, params, *, num_layers, hidden_dim, output_dim):
    """x: (B, T) float32  ->  (B, output_dim) float32 (matches LSTMForecast.forward)."""
    B, T = x.shape
    H = hidden_dim
    L = num_layers
    O = output_dim

    # fill the 8 f32 sublanes: pad batch to a multiple of 8, slice back after
    B_pad = max(8, ((B + 7) // 8) * 8)
    x_p = jnp.zeros((B_pad, T), jnp.float32).at[:B].set(x.astype(jnp.float32))

    # layer 0: W_ih_l0 is (4H, 1) -> its single real row, transposed: (1, 4H)
    wih0 = _scale_g_gate(
        params["weight_ih_l0"].T.reshape(1, 4 * H).astype(jnp.float32), H)

    # hidden->gates weights for every layer, transposed: (L, H, 4H)
    whh_all = _scale_g_gate(
        jnp.stack([params[f"weight_hh_l{l}"].T for l in range(L)]
                  ).astype(jnp.float32), H)

    # input->gates weights for layers >= 1, transposed: (L-1, H, 4H)
    if L > 1:
        wih_rest = _scale_g_gate(
            jnp.stack([params[f"weight_ih_l{l}"].T for l in range(1, L)]
                      ).astype(jnp.float32), H)
    else:
        wih_rest = None  # not passed at all (no dummy DMA)

    bias = _scale_g_gate(
        jnp.stack([
            (params[f"bias_ih_l{l}"] + params[f"bias_hh_l{l}"]).reshape(1, 4 * H)
            for l in range(L)
        ]).astype(jnp.float32), H)                      # (L, 1, 4H)

    if O == 1:
        wfc = params["fc_weight"].reshape(1, H).astype(jnp.float32)   # (1, H)
    else:
        wfc = params["fc_weight"].T.astype(jnp.float32)               # (H, O)
    bfc = params["fc_bias"].reshape(1, O).astype(jnp.float32)         # (1, O)

    kernel = functools.partial(lstm_forecast_kernel, num_layers=L,
                               hidden_dim=H, seq_len=T, output_dim=O)

    Bblk = 8                                           # 8-row batch blocks (f32 sublanes)
    grid = (B_pad // Bblk,)

    in_specs = [
        pl.BlockSpec((Bblk, T), lambda b: (b, 0)),                 # x
        pl.BlockSpec((1, 4 * H), lambda b: (0, 0)),                # wih0
        pl.BlockSpec((L, H, 4 * H), lambda b: (0, 0, 0)),          # whh_all
    ]
    inputs = [x_p, wih0, whh_all]
    if L > 1:
        in_specs.append(pl.BlockSpec((L - 1, H, 4 * H), lambda b: (0, 0, 0)))
        inputs.append(wih_rest)
    in_specs += [
        pl.BlockSpec((L, 1, 4 * H), lambda b: (0, 0, 0)),          # bias
        pl.BlockSpec(wfc.shape, lambda b: (0, 0)),                 # wfc
        pl.BlockSpec((1, O), lambda b: (0, 0)),                    # bfc
    ]
    inputs += [bias, wfc, bfc]
    out_specs = pl.BlockSpec((Bblk, O), lambda b: (b, 0))

    # advisory cost estimate so XLA schedules around the custom call sensibly
    flops = (L * T * 2 * B_pad * H * 4 * H                 # per-step h @ W_hh
             + max(L - 1, 0) * 2 * T * B_pad * H * 4 * H   # batched input matmuls
             + T * B_pad * 2 * 4 * H                       # layer-0 rank-1 path
             + L * T * B_pad * 10 * H                      # cell elementwise (approx)
             + 2 * B_pad * H * O)                          # fc
    transcendentals = L * T * B_pad * (4 * H + H)          # sigmoid(4H) + tanh(H) / cell
    bytes_accessed = 4 * (x_p.size + wih0.size + whh_all.size
                          + (wih_rest.size if L > 1 else 0)
                          + bias.size + wfc.size + bfc.size + B_pad * O)
    cost = pl.CostEstimate(flops=flops, transcendentals=transcendentals,
                           bytes_accessed=bytes_accessed)

    # TODO(synk): weights stay VMEM-resident here (per-layer weight = H*4H*4 B;
    # at H=32, L=2 it's ~32 KiB total).  On v7x (64 MiB physical / 32 MiB scoped)
    # the resident plan breaks at roughly half the H/L budget of v5e/v6e — at
    # large H/L stream per-layer weights from HBM (memory_space=pl.ANY +
    # double-buffered pltpu.make_async_copy or pipeline_mode=pl.Buffered(2)).
    # TODO(synk): optional bf16 weight/h casts for v6e/v7x once the 1e-5
    # tolerance is relaxed.
    out = pl.pallas_call(
        kernel,
        out_shape=jax.ShapeDtypeStruct((B_pad, O), jnp.float32),
        grid=grid,
        in_specs=in_specs,
        out_specs=out_specs,
        compiler_params=pltpu.CompilerParams(
            dimension_semantics=("parallel",),        # batch blocks -> both v7x TCs
            vmem_limit_bytes=32 * 1024 * 1024),
        cost_estimate=cost,
    )(*inputs)

    return out[:B]


def lstm_forecast_ref(x, params, *, num_layers, hidden_dim, output_dim):
    """Pure-JAX reference matching torch semantics exactly (for verification)."""
    B, T = x.shape
    H = hidden_dim
    inp = x[:, :, None].astype(jnp.float32)  # (B, T, 1) == x.unsqueeze(2)
    for l in range(num_layers):
        wih = params[f"weight_ih_l{l}"]
        whh = params[f"weight_hh_l{l}"]
        b = params[f"bias_ih_l{l}"] + params[f"bias_hh_l{l}"]
        h = jnp.zeros((B, H), jnp.float32)
        c = jnp.zeros((B, H), jnp.float32)
        outs = []
        for t in range(T):
            gates = inp[:, t] @ wih.T + h @ whh.T + b
            i = jax.nn.sigmoid(gates[:, 0 * H:1 * H])
            f = jax.nn.sigmoid(gates[:, 1 * H:2 * H])
            g = jnp.tanh(gates[:, 2 * H:3 * H])
            o = jax.nn.sigmoid(gates[:, 3 * H:4 * H])
            c = f * c + i * g
            h = o * jnp.tanh(c)
            outs.append(h)
        inp = jnp.stack(outs, axis=1)
    return inp[:, -1] @ params["fc_weight"].T + params["fc_bias"]


def init_params(key, *, input_dim, hidden_dim, num_layers, output_dim):
    """Deterministic synthetic weights with PyTorch-default uniform(-k, k) ranges."""
    params = {}
    k_lstm = 1.0 / math.sqrt(hidden_dim)
    for l in range(num_layers):
        in_l = input_dim if l == 0 else hidden_dim
        key, k1, k2, k3, k4 = jax.random.split(key, 5)
        params[f"weight_ih_l{l}"] = jax.random.uniform(
            k1, (4 * hidden_dim, in_l), jnp.float32, -k_lstm, k_lstm)
        params[f"weight_hh_l{l}"] = jax.random.uniform(
            k2, (4 * hidden_dim, hidden_dim), jnp.float32, -k_lstm, k_lstm)
        params[f"bias_ih_l{l}"] = jax.random.uniform(
            k3, (4 * hidden_dim,), jnp.float32, -k_lstm, k_lstm)
        params[f"bias_hh_l{l}"] = jax.random.uniform(
            k4, (4 * hidden_dim,), jnp.float32, -k_lstm, k_lstm)
    key, k5, k6 = jax.random.split(key, 3)
    k_fc = 1.0 / math.sqrt(hidden_dim)
    params["fc_weight"] = jax.random.uniform(
        k5, (output_dim, hidden_dim), jnp.float32, -k_fc, k_fc)
    params["fc_bias"] = jax.random.uniform(
        k6, (output_dim,), jnp.float32, -k_fc, k_fc)
    return params


if __name__ == "__main__":
    # forward() does x.unsqueeze(2) => input_dim must be 1
    B, T = 2, 8
    INPUT_DIM, HIDDEN_DIM, NUM_LAYERS, OUTPUT_DIM = 1, 32, 2, 1

    key = jax.random.PRNGKey(0)
    key, kx = jax.random.split(key)
    x = jax.random.normal(kx, (B, T), jnp.float32)

    params = init_params(key, input_dim=INPUT_DIM, hidden_dim=HIDDEN_DIM,
                         num_layers=NUM_LAYERS, output_dim=OUTPUT_DIM)

    out = lstm_forecast(x, params, num_layers=NUM_LAYERS,
                        hidden_dim=HIDDEN_DIM, output_dim=OUTPUT_DIM)
    out = jax.block_until_ready(out)

    ref = lstm_forecast_ref(x, params, num_layers=NUM_LAYERS,
                            hidden_dim=HIDDEN_DIM, output_dim=OUTPUT_DIM)
    ref = jax.block_until_ready(ref)

    assert out.shape == (B, OUTPUT_DIM), out.shape
    assert jnp.allclose(out, ref, atol=1e-5, rtol=1e-5), (out, ref)
    print("KERNEL_OK")
</pallas_src>

<mosaic_0001>
module attributes {stable_mosaic.version = 11 : i64} {
  func.func @lstm_forecast_kernel(%arg0: i32, %arg1: memref<8x8xf32, #tpu.memory_space<vmem>>, %arg2: memref<1x128xf32, #tpu.memory_space<vmem>>, %arg3: memref<2x32x128xf32, #tpu.memory_space<vmem>>, %arg4: memref<1x32x128xf32, #tpu.memory_space<vmem>>, %arg5: memref<2x1x128xf32, #tpu.memory_space<vmem>>, %arg6: memref<1x32xf32, #tpu.memory_space<vmem>>, %arg7: memref<1x1xf32, #tpu.memory_space<vmem>>, %arg8: memref<8x1xf32, #tpu.memory_space<vmem>>) attributes {dimension_semantics = [#tpu.dimension_semantics<parallel>], iteration_bounds = array<i64: 1>, scalar_prefetch = 0 : i64, scratch_operands = 0 : i64, tpu.core_type = #tpu.core_type<tc>, window_params = [{transform_indices = @transform_0, window_bounds = array<i64: 8, 8>}, {pipeline_mode = #tpu.pipeline_mode<synchronous>, transform_indices = @transform_1, window_bounds = array<i64: 1, 128>}, {pipeline_mode = #tpu.pipeline_mode<synchronous>, transform_indices = @transform_2, window_bounds = array<i64: 2, 32, 128>}, {pipeline_mode = #tpu.pipeline_mode<synchronous>, transform_indices = @transform_3, window_bounds = array<i64: 1, 32, 128>}, {pipeline_mode = #tpu.pipeline_mode<synchronous>, transform_indices = @transform_4, window_bounds = array<i64: 2, 1, 128>}, {pipeline_mode = #tpu.pipeline_mode<synchronous>, transform_indices = @transform_5, window_bounds = array<i64: 1, 32>}, {pipeline_mode = #tpu.pipeline_mode<synchronous>, transform_indices = @transform_6, window_bounds = array<i64: 1, 1>}, {transform_indices = @transform_7, window_bounds = array<i64: 8, 1>}]} {
    %0 = tpu.iota {dimensions = array<i32: 1>} : vector<8x128xi32>
    %c64_i32 = arith.constant 64 : i32
    %1 = vector.broadcast %c64_i32 : i32 to vector<8x128xi32>
    %2 = arith.cmpi sge, %0, %1 : vector<8x128xi32>
    %c96_i32 = arith.constant 96 : i32
    %3 = vector.broadcast %c96_i32 : i32 to vector<8x128xi32>
    %4 = arith.cmpi slt, %0, %3 : vector<8x128xi32>
    %5 = arith.andi %2, %4 : vector<8x128xi1>
    %c0 = arith.constant 0 : index
    %c0_0 = arith.constant 0 : index
    %6 = vector.load %arg2[%c0, %c0_0] : memref<1x128xf32, #tpu.memory_space<vmem>>, vector<1x128xf32>
    %c0_1 = arith.constant 0 : index
    %c0_2 = arith.constant 0 : index
    %c0_3 = arith.constant 0 : index
    %7 = vector.load %arg5[%c0_1, %c0_2, %c0_3] : memref<2x1x128xf32, #tpu.memory_space<vmem>>, vector<1x1x128xf32>
    %8 = vector.shape_cast %7 : vector<1x1x128xf32> to vector<1x128xf32>
    %c0_4 = arith.constant 0 : index
    %c0_5 = arith.constant 0 : index
    %9 = vector.load %arg1[%c0_4, %c0_5] : memref<8x8xf32, #tpu.memory_space<vmem>>, vector<8x1xf32>
    %10 = vector.broadcast %9 : vector<8x1xf32> to vector<8x128xf32>
    %11 = vector.broadcast %6 : vector<1x128xf32> to vector<8x128xf32>
    %12 = arith.mulf %10, %11 : vector<8x128xf32>
    %13 = vector.broadcast %8 : vector<1x128xf32> to vector<8x128xf32>
    %14 = arith.addf %12, %13 : vector<8x128xf32>
    %c0_6 = arith.constant 0 : index
    %c1 = arith.constant 1 : index
    %15 = vector.load %arg1[%c0_6, %c1] : memref<8x8xf32, #tpu.memory_space<vmem>>, vector<8x1xf32>
    %16 = vector.broadcast %15 : vector<8x1xf32> to vector<8x128xf32>
    %17 = vector.broadcast %6 : vector<1x128xf32> to vector<8x128xf32>
    %18 = arith.mulf %16, %17 : vector<8x128xf32>
    %19 = vector.broadcast %8 : vector<1x128xf32> to vector<8x128xf32>
    %20 = arith.addf %18, %19 : vector<8x128xf32>
    %c0_7 = arith.constant 0 : index
    %c2 = arith.constant 2 : index
    %21 = vector.load %arg1[%c0_7, %c2] : memref<8x8xf32, #tpu.memory_space<vmem>>, vector<8x1xf32>
    %22 = vector.broadcast %21 : vector<8x1xf32> to vector<8x128xf32>
    %23 = vector.broadcast %6 : vector<1x128xf32> to vector<8x128xf32>
    %24 = arith.mulf %22, %23 : vector<8x128xf32>
    %25 = vector.broadcast %8 : vector<1x128xf32> to vector<8x128xf32>
    %26 = arith.addf %24, %25 : vector<8x128xf32>
    %c0_8 = arith.constant 0 : index
    %c3 = arith.constant 3 : index
    %27 = vector.load %arg1[%c0_8, %c3] : memref<8x8xf32, #tpu.memory_space<vmem>>, vector<8x1xf32>
    %28 = vector.broadcast %27 : vector<8x1xf32> to vector<8x128xf32>
    %29 = vector.broadcast %6 : vector<1x128xf32> to vector<8x128xf32>
    %30 = arith.mulf %28, %29 : vector<8x128xf32>
    %31 = vector.broadcast %8 : vector<1x128xf32> to vector<8x128xf32>
    %32 = arith.addf %30, %31 : vector<8x128xf32>
    %c0_9 = arith.constant 0 : index
    %c4 = arith.constant 4 : index
    %33 = vector.load %arg1[%c0_9, %c4] : memref<8x8xf32, #tpu.memory_space<vmem>>, vector<8x1xf32>
    %34 = vector.broadcast %33 : vector<8x1xf32> to vector<8x128xf32>
    %35 = vector.broadcast %6 : vector<1x128xf32> to vector<8x128xf32>
    %36 = arith.mulf %34, %35 : vector<8x128xf32>
    %37 = vector.broadcast %8 : vector<1x128xf32> to vector<8x128xf32>
    %38 = arith.addf %36, %37 : vector<8x128xf32>
    %c0_10 = arith.constant 0 : index
    %c5 = arith.constant 5 : index
    %39 = vector.load %arg1[%c0_10, %c5] : memref<8x8xf32, #tpu.memory_space<vmem>>, vector<8x1xf32>
    %40 = vector.broadcast %39 : vector<8x1xf32> to vector<8x128xf32>
    %41 = vector.broadcast %6 : vector<1x128xf32> to vector<8x128xf32>
    %42 = arith.mulf %40, %41 : vector<8x128xf32>
    %43 = vector.broadcast %8 : vector<1x128xf32> to vector<8x128xf32>
    %44 = arith.addf %42, %43 : vector<8x128xf32>
    %c0_11 = arith.constant 0 : index
    %c6 = arith.constant 6 : index
    %45 = vector.load %arg1[%c0_11, %c6] : memref<8x8xf32, #tpu.memory_space<vmem>>, vector<8x1xf32>
    %46 = vector.broadcast %45 : vector<8x1xf32> to vector<8x128xf32>
    %47 = vector.broadcast %6 : vector<1x128xf32> to vector<8x128xf32>
    %48 = arith.mulf %46, %47 : vector<8x128xf32>
    %49 = vector.broadcast %8 : vector<1x128xf32> to vector<8x128xf32>
    %50 = arith.addf %48, %49 : vector<8x128xf32>
    %c0_12 = arith.constant 0 : index
    %c7 = arith.constant 7 : index
    %51 = vector.load %arg1[%c0_12, %c7] : memref<8x8xf32, #tpu.memory_space<vmem>>, vector<8x1xf32>
    %52 = vector.broadcast %51 : vector<8x1xf32> to vector<8x128xf32>
    %53 = vector.broadcast %6 : vector<1x128xf32> to vector<8x128xf32>
    %54 = arith.mulf %52, %53 : vector<8x128xf32>
    %55 = vector.broadcast %8 : vector<1x128xf32> to vector<8x128xf32>
    %56 = arith.addf %54, %55 : vector<8x128xf32>
    %c0_13 = arith.constant 0 : index
    %c0_14 = arith.constant 0 : index
    %c0_15 = arith.constant 0 : index
    %57 = vector.load %arg3[%c0_13, %c0_14, %c0_15] : memref<2x32x128xf32, #tpu.memory_space<vmem>>, vector<1x32x128xf32>
    %58 = vector.shape_cast %57 : vector<1x32x128xf32> to vector<32x128xf32>
    %cst = arith.constant 0.000000e+00 : f32
    %59 = vector.broadcast %cst : f32 to vector<8x32xf32>
    %cst_16 = arith.constant 0.000000e+00 : f32
    %60 = vector.broadcast %cst_16 : f32 to vector<8x32xf32>
    %cst_17 = arith.constant dense<0.000000e+00> : vector<8x128xf32>
    %61 = tpu.matmul %59, %58, %cst_17 {dimension_numbers = #tpu.dot_dimension_numbers<[1], [0], [0], [1], [0, 0, 1, 1], [], []>} : vector<8x32xf32>, vector<32x128xf32>, vector<8x128xf32> -> vector<8x128xf32>
    %62 = arith.addf %14, %61 : vector<8x128xf32>
    %63 = arith.negf %62 : vector<8x128xf32>
    %64 = math.exp %63 : vector<8x128xf32>
    %cst_18 = arith.constant 1.000000e+00 : f32
    %65 = vector.broadcast %cst_18 : f32 to vector<8x128xf32>
    %66 = arith.addf %65, %64 : vector<8x128xf32>
    %67 = arith.divf %65, %66 : vector<8x128xf32>
    %cst_19 = arith.constant 2.000000e+00 : f32
    %68 = vector.broadcast %cst_19 : f32 to vector<8x128xf32>
    %69 = arith.mulf %68, %67 : vector<8x128xf32>
    %cst_20 = arith.constant 1.000000e+00 : f32
    %70 = vector.broadcast %cst_20 : f32 to vector<8x128xf32>
    %71 = arith.subf %69, %70 : vector<8x128xf32>
    %72 = arith.select %5, %71, %67 : vector<8x128xi1>, vector<8x128xf32>
    %73 = vector.extract_strided_slice %72 {offsets = [0, 0], sizes = [8, 32], strides = [1, 1]} : vector<8x128xf32> to vector<8x32xf32>
    %74 = vector.extract_strided_slice %72 {offsets = [0, 32], sizes = [8, 32], strides = [1, 1]} : vector<8x128xf32> to vector<8x32xf32>
    %75 = vector.extract_strided_slice %72 {offsets = [0, 64], sizes = [8, 32], strides = [1, 1]} : vector<8x128xf32> to vector<8x32xf32>
    %76 = vector.extract_strided_slice %72 {offsets = [0, 96], sizes = [8, 32], strides = [1, 1]} : vector<8x128xf32> to vector<8x32xf32>
    %77 = arith.mulf %74, %60 : vector<8x32xf32>
    %78 = arith.mulf %73, %75 : vector<8x32xf32>
    %79 = arith.addf %77, %78 : vector<8x32xf32>
    %80 = math.tanh %79 : vector<8x32xf32>
    %81 = arith.mulf %76, %80 : vector<8x32xf32>
    %cst_21 = arith.constant dense<0.000000e+00> : vector<8x128xf32>
    %82 = tpu.matmul %81, %58, %cst_21 {dimension_numbers = #tpu.dot_dimension_numbers<[1], [0], [0], [1], [0, 0, 1, 1], [], []>} : vector<8x32xf32>, vector<32x128xf32>, vector<8x128xf32> -> vector<8x128xf32>
    %83 = arith.addf %20, %82 : vector<8x128xf32>
    %84 = arith.negf %83 : vector<8x128xf32>
    %85 = math.exp %84 : vector<8x128xf32>
    %cst_22 = arith.constant 1.000000e+00 : f32
    %86 = vector.broadcast %cst_22 : f32 to vector<8x128xf32>
    %87 = arith.addf %86, %85 : vector<8x128xf32>
    %88 = arith.divf %86, %87 : vector<8x128xf32>
    %cst_23 = arith.constant 2.000000e+00 : f32
    %89 = vector.broadcast %cst_23 : f32 to vector<8x128xf32>
    %90 = arith.mulf %89, %88 : vector<8x128xf32>
    %cst_24 = arith.constant 1.000000e+00 : f32
    %91 = vector.broadcast %cst_24 : f32 to vector<8x128xf32>
    %92 = arith.subf %90, %91 : vector<8x128xf32>
    %93 = arith.select %5, %92, %88 : vector<8x128xi1>, vector<8x128xf32>
    %94 = vector.extract_strided_slice %93 {offsets = [0, 0], sizes = [8, 32], strides = [1, 1]} : vector<8x128xf32> to vector<8x32xf32>
    %95 = vector.extract_strided_slice %93 {offsets = [0, 32], sizes = [8, 32], strides = [1, 1]} : vector<8x128xf32> to vector<8x32xf32>
    %96 = vector.extract_strided_slice %93 {offsets = [0, 64], sizes = [8, 32], strides = [1, 1]} : vector<8x128xf32> to vector<8x32xf32>
    %97 = vector.extract_strided_slice %93 {offsets = [0, 96], sizes = [8, 32], strides = [1, 1]} : vector<8x128xf32> to vector<8x32xf32>
    %98 = arith.mulf %95, %79 : vector<8x32xf32>
    %99 = arith.mulf %94, %96 : vector<8x32xf32>
    %100 = arith.addf %98, %99 : vector<8x32xf32>
    %101 = math.tanh %100 : vector<8x32xf32>
    %102 = arith.mulf %97, %101 : vector<8x32xf32>
    %cst_25 = arith.constant dense<0.000000e+00> : vector<8x128xf32>
    %103 = tpu.matmul %102, %58, %cst_25 {dimension_numbers = #tpu.dot_dimension_numbers<[1], [0], [0], [1], [0, 0, 1, 1], [], []>} : vector<8x32xf32>, vector<32x128xf32>, vector<8x128xf32> -> vector<8x128xf32>
    %104 = arith.addf %26, %103 : vector<8x128xf32>
    %105 = arith.negf %104 : vector<8x128xf32>
    %106 = math.exp %105 : vector<8x128xf32>
    %cst_26 = arith.constant 1.000000e+00 : f32
    %107 = vector.broadcast %cst_26 : f32 to vector<8x128xf32>
    %108 = arith.addf %107, %106 : vector<8x128xf32>
    %109 = arith.divf %107, %108 : vector<8x128xf32>
    %cst_27 = arith.constant 2.000000e+00 : f32
    %110 = vector.broadcast %cst_27 : f32 to vector<8x128xf32>
    %111 = arith.mulf %110, %109 : vector<8x128xf32>
    %cst_28 = arith.constant 1.000000e+00 : f32
    %112 = vector.broadcast %cst_28 : f32 to vector<8x128xf32>
    %113 = arith.subf %111, %112 : vector<8x128xf32>
    %114 = arith.select %5, %113, %109 : vector<8x128xi1>, vector<8x128xf32>
    %115 = vector.extract_strided_slice %114 {offsets = [0, 0], sizes = [8, 32], strides = [1, 1]} : vector<8x128xf32> to vector<8x32xf32>
    %116 = vector.extract_strided_slice %114 {offsets = [0, 32], sizes = [8, 32], strides = [1, 1]} : vector<8x128xf32> to vector<8x32xf32>
    %117 = vector.extract_strided_slice %114 {offsets = [0, 64], sizes = [8, 32], strides = [1, 1]} : vector<8x128xf32> to vector<8x32xf32>
    %118 = vector.extract_strided_slice %114 {offsets = [0, 96], sizes = [8, 32], strides = [1, 1]} : vector<8x128xf32> to vector<8x32xf32>
    %119 = arith.mulf %116, %100 : vector<8x32xf32>
    %120 = arith.mulf %115, %117 : vector<8x32xf32>
    %121 = arith.addf %119, %120 : vector<8x32xf32>
    %122 = math.tanh %121 : vector<8x32xf32>
    %123 = arith.mulf %118, %122 : vector<8x32xf32>
    %cst_29 = arith.constant dense<0.000000e+00> : vector<8x128xf32>
    %124 = tpu.matmul %123, %58, %cst_29 {dimension_numbers = #tpu.dot_dimension_numbers<[1], [0], [0], [1], [0, 0, 1, 1], [], []>} : vector<8x32xf32>, vector<32x128xf32>, vector<8x128xf32> -> vector<8x128xf32>
    %125 = arith.addf %32, %124 : vector<8x128xf32>
    %126 = arith.negf %125 : vector<8x128xf32>
    %127 = math.exp %126 : vector<8x128xf32>
    %cst_30 = arith.constant 1.000000e+00 : f32
    %128 = vector.broadcast %cst_30 : f32 to vector<8x128xf32>
    %129 = arith.addf %128, %127 : vector<8x128xf32>
    %130 = arith.divf %128, %129 : vector<8x128xf32>
    %cst_31 = arith.constant 2.000000e+00 : f32
    %131 = vector.broadcast %cst_31 : f32 to vector<8x128xf32>
    %132 = arith.mulf %131, %130 : vector<8x128xf32>
    %cst_32 = arith.constant 1.000000e+00 : f32
    %133 = vector.broadcast %cst_32 : f32 to vector<8x128xf32>
    %134 = arith.subf %132, %133 : vector<8x128xf32>
    %135 = arith.select %5, %134, %130 : vector<8x128xi1>, vector<8x128xf32>
    %136 = vector.extract_strided_slice %135 {offsets = [0, 0], sizes = [8, 32], strides = [1, 1]} : vector<8x128xf32> to vector<8x32xf32>
    %137 = vector.extract_strided_slice %135 {offsets = [0, 32], sizes = [8, 32], strides = [1, 1]} : vector<8x128xf32> to vector<8x32xf32>
    %138 = vector.extract_strided_slice %135 {offsets = [0, 64], sizes = [8, 32], strides = [1, 1]} : vector<8x128xf32> to vector<8x32xf32>
    %139 = vector.extract_strided_slice %135 {offsets = [0, 96], sizes = [8, 32], strides = [1, 1]} : vector<8x128xf32> to vector<8x32xf32>
    %140 = arith.mulf %137, %121 : vector<8x32xf32>
    %141 = arith.mulf %136, %138 : vector<8x32xf32>
    %142 = arith.addf %140, %141 : vector<8x32xf32>
    %143 = math.tanh %142 : vector<8x32xf32>
    %144 = arith.mulf %139, %143 : vector<8x32xf32>
    %cst_33 = arith.constant dense<0.000000e+00> : vector<8x128xf32>
    %145 = tpu.matmul %144, %58, %cst_33 {dimension_numbers = #tpu.dot_dimension_numbers<[1], [0], [0], [1], [0, 0, 1, 1], [], []>} : vector<8x32xf32>, vector<32x128xf32>, vector<8x128xf32> -> vector<8x128xf32>
    %146 = arith.addf %38, %145 : vector<8x128xf32>
    %147 = arith.negf %146 : vector<8x128xf32>
    %148 = math.exp %147 : vector<8x128xf32>
    %cst_34 = arith.constant 1.000000e+00 : f32
    %149 = vector.broadcast %cst_34 : f32 to vector<8x128xf32>
    %150 = arith.addf %149, %148 : vector<8x128xf32>
    %151 = arith.divf %149, %150 : vector<8x128xf32>
    %cst_35 = arith.constant 2.000000e+00 : f32
    %152 = vector.broadcast %cst_35 : f32 to vector<8x128xf32>
    %153 = arith.mulf %152, %151 : vector<8x128xf32>
    %cst_36 = arith.constant 1.000000e+00 : f32
    %154 = vector.broadcast %cst_36 : f32 to vector<8x128xf32>
    %155 = arith.subf %153, %154 : vector<8x128xf32>
    %156 = arith.select %5, %155, %151 : vector<8x128xi1>, vector<8x128xf32>
    %157 = vector.extract_strided_slice %156 {offsets = [0, 0], sizes = [8, 32], strides = [1, 1]} : vector<8x128xf32> to vector<8x32xf32>
    %158 = vector.extract_strided_slice %156 {offsets = [0, 32], sizes = [8, 32], strides = [1, 1]} : vector<8x128xf32> to vector<8x32xf32>
    %159 = vector.extract_strided_slice %156 {offsets = [0, 64], sizes = [8, 32], strides = [1, 1]} : vector<8x128xf32> to vector<8x32xf32>
    %160 = vector.extract_strided_slice %156 {offsets = [0, 96], sizes = [8, 32], strides = [1, 1]} : vector<8x128xf32> to vector<8x32xf32>
    %161 = arith.mulf %158, %142 : vector<8x32xf32>
    %162 = arith.mulf %157, %159 : vector<8x32xf32>
    %163 = arith.addf %161, %162 : vector<8x32xf32>
    %164 = math.tanh %163 : vector<8x32xf32>
    %165 = arith.mulf %160, %164 : vector<8x32xf32>
    %cst_37 = arith.constant dense<0.000000e+00> : vector<8x128xf32>
    %166 = tpu.matmul %165, %58, %cst_37 {dimension_numbers = #tpu.dot_dimension_numbers<[1], [0], [0], [1], [0, 0, 1, 1], [], []>} : vector<8x32xf32>, vector<32x128xf32>, vector<8x128xf32> -> vector<8x128xf32>
    %167 = arith.addf %44, %166 : vector<8x128xf32>
    %168 = arith.negf %167 : vector<8x128xf32>
    %169 = math.exp %168 : vector<8x128xf32>
    %cst_38 = arith.constant 1.000000e+00 : f32
    %170 = vector.broadcast %cst_38 : f32 to vector<8x128xf32>
    %171 = arith.addf %170, %169 : vector<8x128xf32>
    %172 = arith.divf %170, %171 : vector<8x128xf32>
    %cst_39 = arith.constant 2.000000e+00 : f32
    %173 = vector.broadcast %cst_39 : f32 to vector<8x128xf32>
    %174 = arith.mulf %173, %172 : vector<8x128xf32>
    %cst_40 = arith.constant 1.000000e+00 : f32
    %175 = vector.broadcast %cst_40 : f32 to vector<8x128xf32>
    %176 = arith.subf %174, %175 : vector<8x128xf32>
    %177 = arith.select %5, %176, %172 : vector<8x128xi1>, vector<8x128xf32>
    %178 = vector.extract_strided_slice %177 {offsets = [0, 0], sizes = [8, 32], strides = [1, 1]} : vector<8x128xf32> to vector<8x32xf32>
    %179 = vector.extract_strided_slice %177 {offsets = [0, 32], sizes = [8, 32], strides = [1, 1]} : vector<8x128xf32> to vector<8x32xf32>
    %180 = vector.extract_strided_slice %177 {offsets = [0, 64], sizes = [8, 32], strides = [1, 1]} : vector<8x128xf32> to vector<8x32xf32>
    %181 = vector.extract_strided_slice %177 {offsets = [0, 96], sizes = [8, 32], strides = [1, 1]} : vector<8x128xf32> to vector<8x32xf32>
    %182 = arith.mulf %179, %163 : vector<8x32xf32>
    %183 = arith.mulf %178, %180 : vector<8x32xf32>
    %184 = arith.addf %182, %183 : vector<8x32xf32>
    %185 = math.tanh %184 : vector<8x32xf32>
    %186 = arith.mulf %181, %185 : vector<8x32xf32>
    %cst_41 = arith.constant dense<0.000000e+00> : vector<8x128xf32>
    %187 = tpu.matmul %186, %58, %cst_41 {dimension_numbers = #tpu.dot_dimension_numbers<[1], [0], [0], [1], [0, 0, 1, 1], [], []>} : vector<8x32xf32>, vector<32x128xf32>, vector<8x128xf32> -> vector<8x128xf32>
    %188 = arith.addf %50, %187 : vector<8x128xf32>
    %189 = arith.negf %188 : vector<8x128xf32>
    %190 = math.exp %189 : vector<8x128xf32>
    %cst_42 = arith.constant 1.000000e+00 : f32
    %191 = vector.broadcast %cst_42 : f32 to vector<8x128xf32>
    %192 = arith.addf %191, %190 : vector<8x128xf32>
    %193 = arith.divf %191, %192 : vector<8x128xf32>
    %cst_43 = arith.constant 2.000000e+00 : f32
    %194 = vector.broadcast %cst_43 : f32 to vector<8x128xf32>
    %195 = arith.mulf %194, %193 : vector<8x128xf32>
    %cst_44 = arith.constant 1.000000e+00 : f32
    %196 = vector.broadcast %cst_44 : f32 to vector<8x128xf32>
    %197 = arith.subf %195, %196 : vector<8x128xf32>
    %198 = arith.select %5, %197, %193 : vector<8x128xi1>, vector<8x128xf32>
    %199 = vector.extract_strided_slice %198 {offsets = [0, 0], sizes = [8, 32], strides = [1, 1]} : vector<8x128xf32> to vector<8x32xf32>
    %200 = vector.extract_strided_slice %198 {offsets = [0, 32], sizes = [8, 32], strides = [1, 1]} : vector<8x128xf32> to vector<8x32xf32>
    %201 = vector.extract_strided_slice %198 {offsets = [0, 64], sizes = [8, 32], strides = [1, 1]} : vector<8x128xf32> to vector<8x32xf32>
    %202 = vector.extract_strided_slice %198 {offsets = [0, 96], sizes = [8, 32], strides = [1, 1]} : vector<8x128xf32> to vector<8x32xf32>
    %203 = arith.mulf %200, %184 : vector<8x32xf32>
    %204 = arith.mulf %199, %201 : vector<8x32xf32>
    %205 = arith.addf %203, %204 : vector<8x32xf32>
    %206 = math.tanh %205 : vector<8x32xf32>
    %207 = arith.mulf %202, %206 : vector<8x32xf32>
    %cst_45 = arith.constant dense<0.000000e+00> : vector<8x128xf32>
    %208 = tpu.matmul %207, %58, %cst_45 {dimension_numbers = #tpu.dot_dimension_numbers<[1], [0], [0], [1], [0, 0, 1, 1], [], []>} : vector<8x32xf32>, vector<32x128xf32>, vector<8x128xf32> -> vector<8x128xf32>
    %209 = arith.addf %56, %208 : vector<8x128xf32>
    %210 = arith.negf %209 : vector<8x128xf32>
    %211 = math.exp %210 : vector<8x128xf32>
    %cst_46 = arith.constant 1.000000e+00 : f32
    %212 = vector.broadcast %cst_46 : f32 to vector<8x128xf32>
    %213 = arith.addf %212, %211 : vector<8x128xf32>
    %214 = arith.divf %212, %213 : vector<8x128xf32>
    %cst_47 = arith.constant 2.000000e+00 : f32
    %215 = vector.broadcast %cst_47 : f32 to vector<8x128xf32>
    %216 = arith.mulf %215, %214 : vector<8x128xf32>
    %cst_48 = arith.constant 1.000000e+00 : f32
    %217 = vector.broadcast %cst_48 : f32 to vector<8x128xf32>
    %218 = arith.subf %216, %217 : vector<8x128xf32>
    %219 = arith.select %5, %218, %214 : vector<8x128xi1>, vector<8x128xf32>
    %220 = vector.extract_strided_slice %219 {offsets = [0, 0], sizes = [8, 32], strides = [1, 1]} : vector<8x128xf32> to vector<8x32xf32>
    %221 = vector.extract_strided_slice %219 {offsets = [0, 32], sizes = [8, 32], strides = [1, 1]} : vector<8x128xf32> to vector<8x32xf32>
    %222 = vector.extract_strided_slice %219 {offsets = [0, 64], sizes = [8, 32], strides = [1, 1]} : vector<8x128xf32> to vector<8x32xf32>
    %223 = vector.extract_strided_slice %219 {offsets = [0, 96], sizes = [8, 32], strides = [1, 1]} : vector<8x128xf32> to vector<8x32xf32>
    %224 = arith.mulf %221, %205 : vector<8x32xf32>
    %225 = arith.mulf %220, %222 : vector<8x32xf32>
    %226 = arith.addf %224, %225 : vector<8x32xf32>
    %227 = math.tanh %226 : vector<8x32xf32>
    %228 = arith.mulf %223, %227 : vector<8x32xf32>
    %229 = tpu.concatenate %81, %102, %123, %144, %165, %186, %207, %228 in 0 : vector<8x32xf32>, vector<8x32xf32>, vector<8x32xf32>, vector<8x32xf32>, vector<8x32xf32>, vector<8x32xf32>, vector<8x32xf32>, vector<8x32xf32> -> vector<64x32xf32>
    %c0_49 = arith.constant 0 : index
    %c0_50 = arith.constant 0 : index
    %c0_51 = arith.constant 0 : index
    %230 = vector.load %arg4[%c0_49, %c0_50, %c0_51] : memref<1x32x128xf32, #tpu.memory_space<vmem>>, vector<1x32x128xf32>
    %231 = vector.shape_cast %230 : vector<1x32x128xf32> to vector<32x128xf32>
    %cst_52 = arith.constant dense<0.000000e+00> : vector<64x128xf32>
    %232 = tpu.matmul %229, %231, %cst_52 {dimension_numbers = #tpu.dot_dimension_numbers<[1], [0], [0], [1], [0, 0, 1, 1], [], []>} : vector<64x32xf32>, vector<32x128xf32>, vector<64x128xf32> -> vector<64x128xf32>
    %c1_53 = arith.constant 1 : index
    %c0_54 = arith.constant 0 : index
    %c0_55 = arith.constant 0 : index
    %233 = vector.load %arg5[%c1_53, %c0_54, %c0_55] : memref<2x1x128xf32, #tpu.memory_space<vmem>>, vector<1x1x128xf32>
    %234 = vector.shape_cast %233 : vector<1x1x128xf32> to vector<1x128xf32>
    %235 = vector.broadcast %234 : vector<1x128xf32> to vector<64x128xf32>
    %236 = arith.addf %232, %235 : vector<64x128xf32>
    %237 = vector.extract_strided_slice %236 {offsets = [0, 0], sizes = [8, 128], strides = [1, 1]} : vector<64x128xf32> to vector<8x128xf32>
    %238 = vector.extract_strided_slice %236 {offsets = [8, 0], sizes = [8, 128], strides = [1, 1]} : vector<64x128xf32> to vector<8x128xf32>
    %239 = vector.extract_strided_slice %236 {offsets = [16, 0], sizes = [8, 128], strides = [1, 1]} : vector<64x128xf32> to vector<8x128xf32>
    %240 = vector.extract_strided_slice %236 {offsets = [24, 0], sizes = [8, 128], strides = [1, 1]} : vector<64x128xf32> to vector<8x128xf32>
    %241 = vector.extract_strided_slice %236 {offsets = [32, 0], sizes = [8, 128], strides = [1, 1]} : vector<64x128xf32> to vector<8x128xf32>
    %242 = vector.extract_strided_slice %236 {offsets = [40, 0], sizes = [8, 128], strides = [1, 1]} : vector<64x128xf32> to vector<8x128xf32>
    %243 = vector.extract_strided_slice %236 {offsets = [48, 0], sizes = [8, 128], strides = [1, 1]} : vector<64x128xf32> to vector<8x128xf32>
    %244 = vector.extract_strided_slice %236 {offsets = [56, 0], sizes = [8, 128], strides = [1, 1]} : vector<64x128xf32> to vector<8x128xf32>
    %c1_56 = arith.constant 1 : index
    %c0_57 = arith.constant 0 : index
    %c0_58 = arith.constant 0 : index
    %245 = vector.load %arg3[%c1_56, %c0_57, %c0_58] : memref<2x32x128xf32, #tpu.memory_space<vmem>>, vector<1x32x128xf32>
    %246 = vector.shape_cast %245 : vector<1x32x128xf32> to vector<32x128xf32>
    %cst_59 = arith.constant 0.000000e+00 : f32
    %247 = vector.broadcast %cst_59 : f32 to vector<8x32xf32>
    %cst_60 = arith.constant 0.000000e+00 : f32
    %248 = vector.broadcast %cst_60 : f32 to vector<8x32xf32>
    %cst_61 = arith.constant dense<0.000000e+00> : vector<8x128xf32>
    %249 = tpu.matmul %247, %246, %cst_61 {dimension_numbers = #tpu.dot_dimension_numbers<[1], [0], [0], [1], [0, 0, 1, 1], [], []>} : vector<8x32xf32>, vector<32x128xf32>, vector<8x128xf32> -> vector<8x128xf32>
    %250 = arith.addf %237, %249 : vector<8x128xf32>
    %251 = arith.negf %250 : vector<8x128xf32>
    %252 = math.exp %251 : vector<8x128xf32>
    %cst_62 = arith.constant 1.000000e+00 : f32
    %253 = vector.broadcast %cst_62 : f32 to vector<8x128xf32>
    %254 = arith.addf %253, %252 : vector<8x128xf32>
    %255 = arith.divf %253, %254 : vector<8x128xf32>
    %cst_63 = arith.constant 2.000000e+00 : f32
    %256 = vector.broadcast %cst_63 : f32 to vector<8x128xf32>
    %257 = arith.mulf %256, %255 : vector<8x128xf32>
    %cst_64 = arith.constant 1.000000e+00 : f32
    %258 = vector.broadcast %cst_64 : f32 to vector<8x128xf32>
    %259 = arith.subf %257, %258 : vector<8x128xf32>
    %260 = arith.select %5, %259, %255 : vector<8x128xi1>, vector<8x128xf32>
    %261 = vector.extract_strided_slice %260 {offsets = [0, 0], sizes = [8, 32], strides = [1, 1]} : vector<8x128xf32> to vector<8x32xf32>
    %262 = vector.extract_strided_slice %260 {offsets = [0, 32], sizes = [8, 32], strides = [1, 1]} : vector<8x128xf32> to vector<8x32xf32>
    %263 = vector.extract_strided_slice %260 {offsets = [0, 64], sizes = [8, 32], strides = [1, 1]} : vector<8x128xf32> to vector<8x32xf32>
    %264 = vector.extract_strided_slice %260 {offsets = [0, 96], sizes = [8, 32], strides = [1, 1]} : vector<8x128xf32> to vector<8x32xf32>
    %265 = arith.mulf %262, %248 : vector<8x32xf32>
    %266 = arith.mulf %261, %263 : vector<8x32xf32>
    %267 = arith.addf %265, %266 : vector<8x32xf32>
    %268 = math.tanh %267 : vector<8x32xf32>
    %269 = arith.mulf %264, %268 : vector<8x32xf32>
    %cst_65 = arith.constant dense<0.000000e+00> : vector<8x128xf32>
    %270 = tpu.matmul %269, %246, %cst_65 {dimension_numbers = #tpu.dot_dimension_numbers<[1], [0], [0], [1], [0, 0, 1, 1], [], []>} : vector<8x32xf32>, vector<32x128xf32>, vector<8x128xf32> -> vector<8x128xf32>
    %271 = arith.addf %238, %270 : vector<8x128xf32>
    %272 = arith.negf %271 : vector<8x128xf32>
    %273 = math.exp %272 : vector<8x128xf32>
    %cst_66 = arith.constant 1.000000e+00 : f32
    %274 = vector.broadcast %cst_66 : f32 to vector<8x128xf32>
    %275 = arith.addf %274, %273 : vector<8x128xf32>
    %276 = arith.divf %274, %275 : vector<8x128xf32>
    %cst_67 = arith.constant 2.000000e+00 : f32
    %277 = vector.broadcast %cst_67 : f32 to vector<8x128xf32>
    %278 = arith.mulf %277, %276 : vector<8x128xf32>
    %cst_68 = arith.constant 1.000000e+00 : f32
    %279 = vector.broadcast %cst_68 : f32 to vector<8x128xf32>
    %280 = arith.subf %278, %279 : vector<8x128xf32>
    %281 = arith.select %5, %280, %276 : vector<8x128xi1>, vector<8x128xf32>
    %282 = vector.extract_strided_slice %281 {offsets = [0, 0], sizes = [8, 32], strides = [1, 1]} : vector<8x128xf32> to vector<8x32xf32>
    %283 = vector.extract_strided_slice %281 {offsets = [0, 32], sizes = [8, 32], strides = [1, 1]} : vector<8x128xf32> to vector<8x32xf32>
    %284 = vector.extract_strided_slice %281 {offsets = [0, 64], sizes = [8, 32], strides = [1, 1]} : vector<8x128xf32> to vector<8x32xf32>
    %285 = vector.extract_strided_slice %281 {offsets = [0, 96], sizes = [8, 32], strides = [1, 1]} : vector<8x128xf32> to vector<8x32xf32>
    %286 = arith.mulf %283, %267 : vector<8x32xf32>
    %287 = arith.mulf %282, %284 : vector<8x32xf32>
    %288 = arith.addf %286, %287 : vector<8x32xf32>
    %289 = math.tanh %288 : vector<8x32xf32>
    %290 = arith.mulf %285, %289 : vector<8x32xf32>
    %cst_69 = arith.constant dense<0.000000e+00> : vector<8x128xf32>
    %291 = tpu.matmul %290, %246, %cst_69 {dimension_numbers = #tpu.dot_dimension_numbers<[1], [0], [0], [1], [0, 0, 1, 1], [], []>} : vector<8x32xf32>, vector<32x128xf32>, vector<8x128xf32> -> vector<8x128xf32>
    %292 = arith.addf %239, %291 : vector<8x128xf32>
    %293 = arith.negf %292 : vector<8x128xf32>
    %294 = math.exp %293 : vector<8x128xf32>
    %cst_70 = arith.constant 1.000000e+00 : f32
    %295 = vector.broadcast %cst_70 : f32 to vector<8x128xf32>
    %296 = arith.addf %295, %294 : vector<8x128xf32>
    %297 = arith.divf %295, %296 : vector<8x128xf32>
    %cst_71 = arith.constant 2.000000e+00 : f32
    %298 = vector.broadcast %cst_71 : f32 to vector<8x128xf32>
    %299 = arith.mulf %298, %297 : vector<8x128xf32>
    %cst_72 = arith.constant 1.000000e+00 : f32
    %300 = vector.broadcast %cst_72 : f32 to vector<8x128xf32>
    %301 = arith.subf %299, %300 : vector<8x128xf32>
    %302 = arith.select %5, %301, %297 : vector<8x128xi1>, vector<8x128xf32>
    %303 = vector.extract_strided_slice %302 {offsets = [0, 0], sizes = [8, 32], strides = [1, 1]} : vector<8x128xf32> to vector<8x32xf32>
    %304 = vector.extract_strided_slice %302 {offsets = [0, 32], sizes = [8, 32], strides = [1, 1]} : vector<8x128xf32> to vector<8x32xf32>
    %305 = vector.extract_strided_slice %302 {offsets = [0, 64], sizes = [8, 32], strides = [1, 1]} : vector<8x128xf32> to vector<8x32xf32>
    %306 = vector.extract_strided_slice %302 {offsets = [0, 96], sizes = [8, 32], strides = [1, 1]} : vector<8x128xf32> to vector<8x32xf32>
    %307 = arith.mulf %304, %288 : vector<8x32xf32>
    %308 = arith.mulf %303, %305 : vector<8x32xf32>
    %309 = arith.addf %307, %308 : vector<8x32xf32>
    %310 = math.tanh %309 : vector<8x32xf32>
    %311 = arith.mulf %306, %310 : vector<8x32xf32>
    %cst_73 = arith.constant dense<0.000000e+00> : vector<8x128xf32>
    %312 = tpu.matmul %311, %246, %cst_73 {dimension_numbers = #tpu.dot_dimension_numbers<[1], [0], [0], [1], [0, 0, 1, 1], [], []>} : vector<8x32xf32>, vector<32x128xf32>, vector<8x128xf32> -> vector<8x128xf32>
    %313 = arith.addf %240, %312 : vector<8x128xf32>
    %314 = arith.negf %313 : vector<8x128xf32>
    %315 = math.exp %314 : vector<8x128xf32>
    %cst_74 = arith.constant 1.000000e+00 : f32
    %316 = vector.broadcast %cst_74 : f32 to vector<8x128xf32>
    %317 = arith.addf %316, %315 : vector<8x128xf32>
    %318 = arith.divf %316, %317 : vector<8x128xf32>
    %cst_75 = arith.constant 2.000000e+00 : f32
    %319 = vector.broadcast %cst_75 : f32 to vector<8x128xf32>
    %320 = arith.mulf %319, %318 : vector<8x128xf32>
    %cst_76 = arith.constant 1.000000e+00 : f32
    %321 = vector.broadcast %cst_76 : f32 to vector<8x128xf32>
    %322 = arith.subf %320, %321 : vector<8x128xf32>
    %323 = arith.select %5, %322, %318 : vector<8x128xi1>, vector<8x128xf32>
    %324 = vector.extract_strided_slice %323 {offsets = [0, 0], sizes = [8, 32], strides = [1, 1]} : vector<8x128xf32> to vector<8x32xf32>
    %325 = vector.extract_strided_slice %323 {offsets = [0, 32], sizes = [8, 32], strides = [1, 1]} : vector<8x128xf32> to vector<8x32xf32>
    %326 = vector.extract_strided_slice %323 {offsets = [0, 64], sizes = [8, 32], strides = [1, 1]} : vector<8x128xf32> to vector<8x32xf32>
    %327 = vector.extract_strided_slice %323 {offsets = [0, 96], sizes = [8, 32], strides = [1, 1]} : vector<8x128xf32> to vector<8x32xf32>
    %328 = arith.mulf %325, %309 : vector<8x32xf32>
    %329 = arith.mulf %324, %326 : vector<8x32xf32>
    %330 = arith.addf %328, %329 : vector<8x32xf32>
    %331 = math.tanh %330 : vector<8x32xf32>
    %332 = arith.mulf %327, %331 : vector<8x32xf32>
    %cst_77 = arith.constant dense<0.000000e+00> : vector<8x128xf32>
    %333 = tpu.matmul %332, %246, %cst_77 {dimension_numbers = #tpu.dot_dimension_numbers<[1], [0], [0], [1], [0, 0, 1, 1], [], []>} : vector<8x32xf32>, vector<32x128xf32>, vector<8x128xf32> -> vector<8x128xf32>
    %334 = arith.addf %241, %333 : vector<8x128xf32>
    %335 = arith.negf %334 : vector<8x128xf32>
    %336 = math.exp %335 : vector<8x128xf32>
    %cst_78 = arith.constant 1.000000e+00 : f32
    %337 = vector.broadcast %cst_78 : f32 to vector<8x128xf32>
    %338 = arith.addf %337, %336 : vector<8x128xf32>
    %339 = arith.divf %337, %338 : vector<8x128xf32>
    %cst_79 = arith.constant 2.000000e+00 : f32
    %340 = vector.broadcast %cst_79 : f32 to vector<8x128xf32>
    %341 = arith.mulf %340, %339 : vector<8x128xf32>
    %cst_80 = arith.constant 1.000000e+00 : f32
    %342 = vector.broadcast %cst_80 : f32 to vector<8x128xf32>
    %343 = arith.subf %341, %342 : vector<8x128xf32>
    %344 = arith.select %5, %343, %339 : vector<8x128xi1>, vector<8x128xf32>
    %345 = vector.extract_strided_slice %344 {offsets = [0, 0], sizes = [8, 32], strides = [1, 1]} : vector<8x128xf32> to vector<8x32xf32>
    %346 = vector.extract_strided_slice %344 {offsets = [0, 32], sizes = [8, 32], strides = [1, 1]} : vector<8x128xf32> to vector<8x32xf32>
    %347 = vector.extract_strided_slice %344 {offsets = [0, 64], sizes = [8, 32], strides = [1, 1]} : vector<8x128xf32> to vector<8x32xf32>
    %348 = vector.extract_strided_slice %344 {offsets = [0, 96], sizes = [8, 32], strides = [1, 1]} : vector<8x128xf32> to vector<8x32xf32>
    %349 = arith.mulf %346, %330 : vector<8x32xf32>
    %350 = arith.mulf %345, %347 : vector<8x32xf32>
    %351 = arith.addf %349, %350 : vector<8x32xf32>
    %352 = math.tanh %351 : vector<8x32xf32>
    %353 = arith.mulf %348, %352 : vector<8x32xf32>
    %cst_81 = arith.constant dense<0.000000e+00> : vector<8x128xf32>
    %354 = tpu.matmul %353, %246, %cst_81 {dimension_numbers = #tpu.dot_dimension_numbers<[1], [0], [0], [1], [0, 0, 1, 1], [], []>} : vector<8x32xf32>, vector<32x128xf32>, vector<8x128xf32> -> vector<8x128xf32>
    %355 = arith.addf %242, %354 : vector<8x128xf32>
    %356 = arith.negf %355 : vector<8x128xf32>
    %357 = math.exp %356 : vector<8x128xf32>
    %cst_82 = arith.constant 1.000000e+00 : f32
    %358 = vector.broadcast %cst_82 : f32 to vector<8x128xf32>
    %359 = arith.addf %358, %357 : vector<8x128xf32>
    %360 = arith.divf %358, %359 : vector<8x128xf32>
    %cst_83 = arith.constant 2.000000e+00 : f32
    %361 = vector.broadcast %cst_83 : f32 to vector<8x128xf32>
    %362 = arith.mulf %361, %360 : vector<8x128xf32>
    %cst_84 = arith.constant 1.000000e+00 : f32
    %363 = vector.broadcast %cst_84 : f32 to vector<8x128xf32>
    %364 = arith.subf %362, %363 : vector<8x128xf32>
    %365 = arith.select %5, %364, %360 : vector<8x128xi1>, vector<8x128xf32>
    %366 = vector.extract_strided_slice %365 {offsets = [0, 0], sizes = [8, 32], strides = [1, 1]} : vector<8x128xf32> to vector<8x32xf32>
    %367 = vector.extract_strided_slice %365 {offsets = [0, 32], sizes = [8, 32], strides = [1, 1]} : vector<8x128xf32> to vector<8x32xf32>
    %368 = vector.extract_strided_slice %365 {offsets = [0, 64], sizes = [8, 32], strides = [1, 1]} : vector<8x128xf32> to vector<8x32xf32>
    %369 = vector.extract_strided_slice %365 {offsets = [0, 96], sizes = [8, 32], strides = [1, 1]} : vector<8x128xf32> to vector<8x32xf32>
    %370 = arith.mulf %367, %351 : vector<8x32xf32>
    %371 = arith.mulf %366, %368 : vector<8x32xf32>
    %372 = arith.addf %370, %371 : vector<8x32xf32>
    %373 = math.tanh %372 : vector<8x32xf32>
    %374 = arith.mulf %369, %373 : vector<8x32xf32>
    %cst_85 = arith.constant dense<0.000000e+00> : vector<8x128xf32>
    %375 = tpu.matmul %374, %246, %cst_85 {dimension_numbers = #tpu.dot_dimension_numbers<[1], [0], [0], [1], [0, 0, 1, 1], [], []>} : vector<8x32xf32>, vector<32x128xf32>, vector<8x128xf32> -> vector<8x128xf32>
    %376 = arith.addf %243, %375 : vector<8x128xf32>
    %377 = arith.negf %376 : vector<8x128xf32>
    %378 = math.exp %377 : vector<8x128xf32>
    %cst_86 = arith.constant 1.000000e+00 : f32
    %379 = vector.broadcast %cst_86 : f32 to vector<8x128xf32>
    %380 = arith.addf %379, %378 : vector<8x128xf32>
    %381 = arith.divf %379, %380 : vector<8x128xf32>
    %cst_87 = arith.constant 2.000000e+00 : f32
    %382 = vector.broadcast %cst_87 : f32 to vector<8x128xf32>
    %383 = arith.mulf %382, %381 : vector<8x128xf32>
    %cst_88 = arith.constant 1.000000e+00 : f32
    %384 = vector.broadcast %cst_88 : f32 to vector<8x128xf32>
    %385 = arith.subf %383, %384 : vector<8x128xf32>
    %386 = arith.select %5, %385, %381 : vector<8x128xi1>, vector<8x128xf32>
    %387 = vector.extract_strided_slice %386 {offsets = [0, 0], sizes = [8, 32], strides = [1, 1]} : vector<8x128xf32> to vector<8x32xf32>
    %388 = vector.extract_strided_slice %386 {offsets = [0, 32], sizes = [8, 32], strides = [1, 1]} : vector<8x128xf32> to vector<8x32xf32>
    %389 = vector.extract_strided_slice %386 {offsets = [0, 64], sizes = [8, 32], strides = [1, 1]} : vector<8x128xf32> to vector<8x32xf32>
    %390 = vector.extract_strided_slice %386 {offsets = [0, 96], sizes = [8, 32], strides = [1, 1]} : vector<8x128xf32> to vector<8x32xf32>
    %391 = arith.mulf %388, %372 : vector<8x32xf32>
    %392 = arith.mulf %387, %389 : vector<8x32xf32>
    %393 = arith.addf %391, %392 : vector<8x32xf32>
    %394 = math.tanh %393 : vector<8x32xf32>
    %395 = arith.mulf %390, %394 : vector<8x32xf32>
    %cst_89 = arith.constant dense<0.000000e+00> : vector<8x128xf32>
    %396 = tpu.matmul %395, %246, %cst_89 {dimension_numbers = #tpu.dot_dimension_numbers<[1], [0], [0], [1], [0, 0, 1, 1], [], []>} : vector<8x32xf32>, vector<32x128xf32>, vector<8x128xf32> -> vector<8x128xf32>
    %397 = arith.addf %244, %396 : vector<8x128xf32>
    %398 = arith.negf %397 : vector<8x128xf32>
    %399 = math.exp %398 : vector<8x128xf32>
    %cst_90 = arith.constant 1.000000e+00 : f32
    %400 = vector.broadcast %cst_90 : f32 to vector<8x128xf32>
    %401 = arith.addf %400, %399 : vector<8x128xf32>
    %402 = arith.divf %400, %401 : vector<8x128xf32>
    %cst_91 = arith.constant 2.000000e+00 : f32
    %403 = vector.broadcast %cst_91 : f32 to vector<8x128xf32>
    %404 = arith.mulf %403, %402 : vector<8x128xf32>
    %cst_92 = arith.constant 1.000000e+00 : f32
    %405 = vector.broadcast %cst_92 : f32 to vector<8x128xf32>
    %406 = arith.subf %404, %405 : vector<8x128xf32>
    %407 = arith.select %5, %406, %402 : vector<8x128xi1>, vector<8x128xf32>
    %408 = vector.extract_strided_slice %407 {offsets = [0, 0], sizes = [8, 32], strides = [1, 1]} : vector<8x128xf32> to vector<8x32xf32>
    %409 = vector.extract_strided_slice %407 {offsets = [0, 32], sizes = [8, 32], strides = [1, 1]} : vector<8x128xf32> to vector<8x32xf32>
    %410 = vector.extract_strided_slice %407 {offsets = [0, 64], sizes = [8, 32], strides = [1, 1]} : vector<8x128xf32> to vector<8x32xf32>
    %411 = vector.extract_strided_slice %407 {offsets = [0, 96], sizes = [8, 32], strides = [1, 1]} : vector<8x128xf32> to vector<8x32xf32>
    %412 = arith.mulf %409, %393 : vector<8x32xf32>
    %413 = arith.mulf %408, %410 : vector<8x32xf32>
    %414 = arith.addf %412, %413 : vector<8x32xf32>
    %415 = math.tanh %414 : vector<8x32xf32>
    %416 = arith.mulf %411, %415 : vector<8x32xf32>
    %c0_93 = arith.constant 0 : index
    %c0_94 = arith.constant 0 : index
    %417 = vector.load %arg6[%c0_93, %c0_94] : memref<1x32xf32, #tpu.memory_space<vmem>>, vector<1x32xf32>
    %418 = vector.broadcast %417 : vector<1x32xf32> to vector<8x32xf32>
    %419 = arith.mulf %416, %418 : vector<8x32xf32>
    %cst_95 = arith.constant dense<0.000000e+00> : vector<8xf32>
    %420 = vector.multi_reduction <add>, %419, %cst_95 [1] : vector<8x32xf32> to vector<8xf32>
    %421 = vector.shape_cast %420 : vector<8xf32> to vector<8x1xf32>
    %c0_96 = arith.constant 0 : index
    %c0_97 = arith.constant 0 : index
    %422 = vector.load %arg7[%c0_96, %c0_97] : memref<1x1xf32, #tpu.memory_space<vmem>>, vector<1x1xf32>
    %423 = vector.broadcast %422 : vector<1x1xf32> to vector<8x1xf32>
    %424 = arith.addf %421, %423 : vector<8x1xf32>
    %c0_98 = arith.constant 0 : index
    %c0_99 = arith.constant 0 : index
    %425 = vector.load %arg8[%c0_98, %c0_99] : memref<8x1xf32, #tpu.memory_space<vmem>>, vector<8x1xf32>
    tpu.vector_store %arg8[%c0_98, %c0_99], %424 {strides = array<i32>} : memref<8x1xf32, #tpu.memory_space<vmem>>, vector<8x1xf32>,
    return
  }
  func.func @transform_0(%arg0: i32) -> (i32, i32) {
    %c0_i32 = arith.constant 0 : i32
    %c0_i32_0 = arith.constant 0 : i32
    return %arg0, %c0_i32 : i32, i32
  }
  func.func @transform_1(%arg0: i32) -> (i32, i32) {
    %c0_i32 = arith.constant 0 : i32
    %c0_i32_0 = arith.constant 0 : i32
    %c0_i32_1 = arith.constant 0 : i32
    return %c0_i32, %c0_i32_0 : i32, i32
  }
  func.func @transform_2(%arg0: i32) -> (i32, i32, i32) {
    %c0_i32 = arith.constant 0 : i32
    %c0_i32_0 = arith.constant 0 : i32
    %c0_i32_1 = arith.constant 0 : i32
    %c0_i32_2 = arith.constant 0 : i32
    return %c0_i32, %c0_i32_0, %c0_i32_1 : i32, i32, i32
  }
  func.func @transform_3(%arg0: i32) -> (i32, i32, i32) {
    %c0_i32 = arith.constant 0 : i32
    %c0_i32_0 = arith.constant 0 : i32
    %c0_i32_1 = arith.constant 0 : i32
    %c0_i32_2 = arith.constant 0 : i32
    return %c0_i32, %c0_i32_0, %c0_i32_1 : i32, i32, i32
  }
  func.func @transform_4(%arg0: i32) -> (i32, i32, i32) {
    %c0_i32 = arith.constant 0 : i32
    %c0_i32_0 = arith.constant 0 : i32
    %c0_i32_1 = arith.constant 0 : i32
    %c0_i32_2 = arith.constant 0 : i32
    return %c0_i32, %c0_i32_0, %c0_i32_1 : i32, i32, i32
  }
  func.func @transform_5(%arg0: i32) -> (i32, i32) {
    %c0_i32 = arith.constant 0 : i32
    %c0_i32_0 = arith.constant 0 : i32
    %c0_i32_1 = arith.constant 0 : i32
    return %c0_i32, %c0_i32_0 : i32, i32
  }
  func.func @transform_6(%arg0: i32) -> (i32, i32) {
    %c0_i32 = arith.constant 0 : i32
    %c0_i32_0 = arith.constant 0 : i32
    %c0_i32_1 = arith.constant 0 : i32
    return %c0_i32, %c0_i32_0 : i32, i32
  }
  func.func @transform_7(%arg0: i32) -> (i32, i32) {
    %c0_i32 = arith.constant 0 : i32
    %c0_i32_0 = arith.constant 0 : i32
    return %arg0, %c0_i32 : i32, i32
  }
}

</mosaic_0001>

<bundles_post_ra>
// kernel: tpu_custom_call.1
= control target key start
LH: loop header
LB: loop body
LE: loop exit
PB: predicated region body
PF: predicated region fallthrough
CT: control target
= control target key end

     0   :  { %s3000_s0 = inlined_call_operand.hbm [shape: f32[8,8], index: 0, kind: input, shape index: {}]   ;;  %s3001_s1 = inlined_call_operand.vmem [shape: f32[1,128], index: 1, kind: input, shape index: {}]   ;;  %s3002_s2 = inlined_call_operand.hbm [shape: f32[2,32,128], index: 2, kind: input, shape index: {}]   ;;  %s3003_s3 = inlined_call_operand.hbm [shape: f32[1,32,128], index: 3, kind: input, shape index: {}]   ;;  %s3004_s4 = inlined_call_operand.vmem [shape: f32[2,1,128], index: 4, kind: input, shape index: {}]   ;;  %s3005_s5 = inlined_call_operand.vmem [shape: f32[1,32], index: 5, kind: input, shape index: {}]   ;;  %s3006_s6 = inlined_call_operand.<no memory space> [shape: f32[1,1], index: 6, kind: input, shape index: {}]   ;;  %s3007_s7 = inlined_call_operand.vmem [shape: f32[8,1], index: 7, kind: output, shape index: {}]  }
   0x1   :  { %v12_v0 = vstv %s3006_s6 }
   0x2   :  { %13 = vst [vmem:[#allocation2] sm:$0x1] %v12_v0 }
   0x3   :  { %14 = vsyncpa [#allocation4], 0 }
   0x4   :  { %15 = vsyncpa [#allocation6], 0  ;;  %s2571_s26 = smov [#allocation5]   ;;  %s2501_s30 = scalar_lea.hbm %s3002_s2, 1024 }
   0x5   :  { %s33_s27 = sshll.u32 %s2571_s26, 4  ;;  %p2502_p0 = scmp.ne.s32.totalorder %s3002_s2, %s2501_s30  ;;  %s34_s27 = int_to_ptr.vmem [resolvable:$true] %s33_s27 }
   0x6   :  { %p2505_p1 = scmp.lt.u32.totalorder %s2501_s30, %s3002_s2 }
   0x8   :  { %p2507_p2 = pnand %p2505_p1, %p2502_p0 }
   0xa   :  { %2510 = shalt.err (!%p2507_p2)
}
   0xb   :  { %s2511_s6 = scalar_lea.vmem %s34_s27, 1024  ;;  %p2516_p4 = scmp.lt.s32.totalorder %s34_s27, %s34_s27 }
   0xc   :  { %p2512_p3 = scmp.ne.s32.totalorder %s34_s27, %s2511_s6  ;;  %p2517_p5 = scmp.lt.s32.totalorder %s2511_s6, %s2511_s6 }
   0xe   :  { %p2518_p6 = por %p2517_p5, %p2516_p4 }
  0x10   :  { %p2519_p7 = pnand %p2518_p6, %p2512_p3 }
  0x12   :  { %2522 = shalt.err (!%p2519_p7)
}
  0x13   :  { %s2572_s12 = smov 128   ;;  %s2573_s13 = smov 8  }
  0x14   :  { %39 = dma.hbm_to_vmem [thread:$0]  %s3002_s2, 1024, %s34_s27, [#allocation6], %s2572_s12, %s2572_s12, %s2573_s13  }
  0x15   :  { %s2574_s16 = smov [#allocation3]   ;;  %s2575_s18 = smov [#allocation7]  }
  0x16   :  { %s22_s17 = sshll.u32 %s2574_s16, 4  ;;  %s45_s19 = sshll.u32 %s2575_s18, 4  ;;  %s23_s17 = int_to_ptr.vmem [resolvable:$true] %s22_s17  ;;  %s46_s19 = int_to_ptr.vmem [resolvable:$true] %s45_s19 }
  0x17   :  { %s2523_s22 = scalar_lea.hbm %s3000_s0, 128 }
  0x18   :  { %p2524_p8 = scmp.ne.s32.totalorder %s3000_s0, %s2523_s22  ;;  %p2527_p9 = scmp.lt.u32.totalorder %s2523_s22, %s3000_s0 }
  0x1a   :  { %p2529_p10 = pnand %p2527_p9, %p2524_p8 }
  0x1c   :  { %2532 = shalt.err (!%p2529_p10)
}
  0x1d   :  { %s2533_s2 = scalar_lea.vmem %s23_s17, 128  ;;  %p2538_p12 = scmp.lt.s32.totalorder %s23_s17, %s23_s17 }
  0x1e   :  { %p2534_p11 = scmp.ne.s32.totalorder %s23_s17, %s2533_s2  ;;  %p2539_p13 = scmp.lt.s32.totalorder %s2533_s2, %s2533_s2 }
  0x20   :  { %p2540_p0 = por %p2539_p13, %p2538_p12 }
  0x22   :  { %p2541_p1 = pnand %p2540_p0, %p2534_p11 }
  0x24   :  { %2544 = shalt.err (!%p2541_p1)
}
  0x25   :  { %25 = dma.hbm_to_vmem [thread:$0]  %s3000_s0, 128, %s23_s17, [#allocation4]  }
  0x26   :  { %s2545_s8 = scalar_lea.hbm %s3003_s3, 512 }
  0x27   :  { %p2546_p2 = scmp.ne.s32.totalorder %s3003_s3, %s2545_s8  ;;  %p2549_p3 = scmp.lt.u32.totalorder %s2545_s8, %s3003_s3 }
  0x29   :  { %p2551_p4 = pnand %p2549_p3, %p2546_p2 }
  0x2b   :  { %2554 = shalt.err (!%p2551_p4)
}
  0x2c   :  { %s2555_s14 = scalar_lea.vmem %s46_s19, 512  ;;  %p2560_p6 = scmp.lt.s32.totalorder %s46_s19, %s46_s19 }
  0x2d   :  { %p2556_p5 = scmp.ne.s32.totalorder %s46_s19, %s2555_s14  ;;  %p2561_p7 = scmp.lt.s32.totalorder %s2555_s14, %s2555_s14 }
  0x2f   :  { %p2562_p8 = por %p2561_p7, %p2560_p6 }
  0x31   :  { %p2563_p9 = pnand %p2562_p8, %p2556_p5 }
  0x33   :  { %2566 = shalt.err (!%p2563_p9)
}
  0x34   :  { %51 = dma.hbm_to_vmem [thread:$0]  %s3003_s3, 512, %s46_s19, [#allocation6], %s2572_s12, %s2572_s12, %s2573_s13  }
  0x35   :  { %2567 = dma.done.wait [#allocation4], 128  }
  0x36   :  { %2568 = vsyncadd [#allocation4], 4294967168 }
  0x37   :  { %2569 = dma.done.wait [#allocation6], 1536  }
  0x38   :  { %2570 = vsyncadd [#allocation6], 4294965760  ;;  %v2576_v1 = vmov 0.0|0.0   ;;  %vm2577_vm0 = vmmov 0   ;;  %v2578_v2 = vmov 0.0   ;;  %v2579_v3 = vmov 0  }
  0x39   :  { %2274 = vmatprep.subr.bf16.mxu0 %v2576_v1  ;;  %2086 = vmatprep.mubr.msk.f32.mxu0 %vm2577_vm0, %v2578_v2  ;;  %v136_v4 = vld [vmem:[#allocation5] sm:$0xff]  ;;  %v137_v5 = vld [vmem:[#allocation5 + $0x8] sm:$0xff]  ;;  %v138_v6 = vld [vmem:[#allocation5 + $0x10] sm:$0xff]  ;;  %v67_v22 = vlaneseq  ;;  %s2581_s17 = smov 32   ;;  %v2582_v35 = vmov 1   ;;  %vm140_vm4 = vcmask 261120  }
  0x3a   :  { %2397 = vset.pattern.permute.xlu0 %v2579_v3  ;;  %2280 = vmatprep.subr.bf16.mxu1 %v2576_v1  ;;  %v2681_v7 = vpack.c.bf16 %v137_v5, %v136_v4  ;;  %v139_v8 = vld [vmem:[#allocation5 + $0x18] sm:$0xff]  ;;  %v2706_v12 = vld [vmem:[%s3001_s1] ss:$0 sm:$0xff]  ;;  %s2580_s1 = smov 64   ;;  %v2583_v58 = vmov 2   ;;  %s2589_s21 = smov 96  }
  0x3b   :  { %2097 = vmatprep.mubr.msk.f32.mxu1 %vm2577_vm0, %v2578_v2  ;;  %v2683_v9 = vld [vmem:[#allocation3] sm:$0xff]  ;;  %v2687_v10 = vpack.c.bf16 %v139_v8, %v138_v6  ;;  %v2712_v14 = vld [vmem:[%s3004_s4] ss:$0 sm:$0xff]  ;;  %v68_v23 = vand.u32 127, %v67_v22  ;;  %2398 = vset.pattern.permute.xlu1 %v2582_v35  ;;  %vm1918_vm5 = vcmask 7168  }
  0x3c   :  { %77 = vperm.xlu0 %2397, %v2683_v9   ;;  %2276 = vmatpush3.bf16.msra.mxu0 %v2681_v7 }
  0x3d   :  { %2282 = vmatpush3.bf16.msra.mxu1 %v2681_v7  ;;  %2277 = vmatprep.subr.bf16.mxu0 %v2576_v1  ;;  %vm69_vm1 = vcmp.ge.s32.totalorder %v68_v23, 64  ;;  %vm70_vm2 = vcmp.lt.s32.totalorder %v68_v23, 96 }
  0x3e   :  { %2283 = vmatprep.subr.bf16.mxu1 %v2576_v1  ;;  %vm2715_vm3 = vmand %vm69_vm1, %vm70_vm2 }
  0x40   :  { %2279 = vmatpush3.bf16.msra.mxu0 %v2687_v10  ;;  %2399 = vset.pattern.permute.xlu0 %v2583_v58 }
  0x41   :  { %2285 = vmatpush3.bf16.msra.mxu1 %v2687_v10  ;;  %2286 = vmatprep.subr.bf16.mxu0 %v2576_v1 }
  0x42   :  { %2292 = vmatprep.subr.bf16.mxu1 %v2576_v1 }
  0x43   :  { %2087 = vmatmul.mubr.f32.vlgmr.msra.gmra.mrb[0].mxu0 %v2578_v2 }
  0x44   :  { %2288 = vmatpush3.bf16.msra.mxu0 %v2681_v7  ;;  %2108 = vmatprep.mubr.msk.f32.mxu0 %vm2577_vm0, %v2578_v2 }
  0x45   :  { %2289 = vmatprep.subr.bf16.mxu0 %v2576_v1 }
  0x48   :  { %2291 = vmatpush3.bf16.msra.mxu0 %v2687_v10 }
  0x49   :  { %2298 = vmatprep.subr.bf16.mxu0 %v2576_v1 }
  0xbb   :  { %v78_v11 = vpop.permute.xlu0 %77 }
  0xbc   :  { %v86_v13 = vmul.f32 %v2706_v12, %v78_v11 }
  0xbe   :  { %v93_v15 = vadd.f32 %v2712_v14, %v86_v13 }
 0x116   :  { %v210_v16 = vpop.f32.mrb[0].mxu0 }
 0x117   :  { %v214_v17 = vadd.f32 %v210_v16, %v93_v15  ;;  %v2088_v18 = vpop.f32.mrb[1].mxu0 }
 0x119   :  { %v1928_v19 = vmul.f32 -1.442695, %v214_v17 }
 0x11b   :  { %2405 = vpow2.f32 %v1928_v19 }
 0x125   :  { %v2406_v20 = vpop.eup %2405 }
 0x126   :  { %v218_v21 = vadd.f32 1.0, %v2406_v20 }
 0x128   :  { %2407 = vrcp.f32 %v218_v21 }
 0x132   :  { %v2408_v24 = vpop.eup %2407 }
 0x133   :  { %v221_v25 = vmul.f32 2.0, %v2408_v24 }
 0x135   :  { %v1929_v27 = vadd.f32 -1.0, %v221_v25 }
 0x137   :  { %v223_v28 = vsel %vm2715_vm3, %v1929_v27, %v2408_v24  ;;  %v2584_v24 = vmov 3  }
 0x138   :  { %226 = vrot.lane.b32.xlu0 %v223_v28, %s2580_s1  ;;  %v224_v31 = vmul.f32 0.0, %v223_v28 }
 0x1aa   :  { %v227_v29 = vpop.permute.xlu0 %226 }
 0x1ab   :  { %v229_v30 = vmul.f32 %v227_v29, %v223_v28 }
 0x1ad   :  { %231 = vrot.lane.b32.xlu1 %v229_v30, %s2581_s17 }
 0x21f   :  { %v232_v32 = vpop.permute.xlu1 %231 }
 0x220   :  { %v234_v33 = vadd.f32 %v232_v32, %v224_v31 }
 0x222   :  { %2409 = vtanh.f32 %v234_v33 }
 0x22c   :  { %v2410_v34 = vpop.eup %2409 }
 0x22d   :  { %237 = vrot.lane.b32.xlu1 %v2410_v34, %s2580_s1 }
 0x231   :  { %95 = vperm.xlu1 %2398, %v2683_v9  }
 0x29f   :  { %v238_v36 = vpop.permute.xlu1 %237 }
 0x2a0   :  { %v240_v37 = vmul.f32 %v238_v36, %v223_v28 }
 0x2a2   :  { %242 = vrot.lane.b32.xlu0 %v240_v37, %s2581_s17 }
 0x2b0   :  { %v96_v39 = vpop.permute.xlu1 %95 }
 0x2b1   :  { %v98_v40 = vmul.f32 %v2706_v12, %v96_v39 }
 0x2b3   :  { %v99_v41 = vadd.f32 %v2712_v14, %v98_v40 }
 0x314   :  { %v2726_v38 = vpop.permute.xlu0 %242 }
 0x315   :  { %2098 = vmatmul.mubr.msk.f32.vlgmr.msra.gmra.mrb[0].mxu1 %vm140_vm4, %v2726_v38 }
 0x316   :  { %2294 = vmatpush3.bf16.msra.mxu1 %v2681_v7  ;;  %2119 = vmatprep.mubr.msk.f32.mxu1 %vm2577_vm0, %v2578_v2 }
 0x317   :  { %2295 = vmatprep.subr.bf16.mxu1 %v2576_v1 }
 0x31a   :  { %2297 = vmatpush3.bf16.msra.mxu1 %v2687_v10 }
 0x31b   :  { %2304 = vmatprep.subr.bf16.mxu1 %v2576_v1 }
 0x3e8   :  { %v312_v42 = vpop.f32.mrb[0].mxu1 }
 0x3e9   :  { %v316_v43 = vadd.f32 %v312_v42, %v99_v41  ;;  %v2099_v44 = vpop.f32.mrb[1].mxu1 }
 0x3eb   :  { %v1931_v45 = vmul.f32 -1.442695, %v316_v43 }
 0x3ed   :  { %2411 = vpow2.f32 %v1931_v45 }
 0x3f7   :  { %v2412_v46 = vpop.eup %2411 }
 0x3f8   :  { %v320_v47 = vadd.f32 1.0, %v2412_v46 }
 0x3fa   :  { %2413 = vrcp.f32 %v320_v47 }
 0x404   :  { %v2414_v48 = vpop.eup %2413 }
 0x405   :  { %v323_v49 = vmul.f32 2.0, %v2414_v48 }
 0x407   :  { %v1932_v50 = vadd.f32 -1.0, %v323_v49  ;;  %v2585_v49 = vmov 4  }
 0x409   :  { %v325_v51 = vsel %vm2715_vm3, %v1932_v50, %v2414_v48 }
 0x40a   :  { %328 = vrot.lane.b32.xlu0 %v325_v51, %s2580_s1  ;;  %v326_v54 = vmul.f32 %v325_v51, %v234_v33 }
 0x47c   :  { %v329_v52 = vpop.permute.xlu0 %328 }
 0x47d   :  { %v331_v53 = vmul.f32 %v329_v52, %v325_v51 }
 0x47f   :  { %333 = vrot.lane.b32.xlu1 %v331_v53, %s2581_s17 }
 0x4f1   :  { %v334_v55 = vpop.permute.xlu1 %333 }
 0x4f2   :  { %v336_v56 = vadd.f32 %v334_v55, %v326_v54 }
 0x4f4   :  { %2415 = vtanh.f32 %v336_v56 }
 0x4fe   :  { %v2416_v57 = vpop.eup %2415 }
 0x4ff   :  { %339 = vrot.lane.b32.xlu0 %v2416_v57, %s2580_s1 }
 0x503   :  { %101 = vperm.xlu0 %2399, %v2683_v9  }
 0x507   :  { %2400 = vset.pattern.permute.xlu0 %v2584_v24 }
 0x571   :  { %v340_v59 = vpop.permute.xlu0 %339 }
 0x572   :  { %v342_v60 = vmul.f32 %v340_v59, %v325_v51 }
 0x574   :  { %344 = vrot.lane.b32.xlu1 %v342_v60, %s2581_s17 }
 0x582   :  { %v102_v62 = vpop.permute.xlu0 %101 }
 0x583   :  { %v104_v63 = vmul.f32 %v2706_v12, %v102_v62 }
 0x585   :  { %v105_v0 = vadd.f32 %v2712_v14, %v104_v63 }
 0x5e6   :  { %v2745_v61 = vpop.permute.xlu1 %344 }
 0x5e7   :  { %2109 = vmatmul.mubr.msk.f32.vlgmr.msra.gmra.mrb[2].mxu0 %vm140_vm4, %v2745_v61 }
 0x5e8   :  { %2300 = vmatpush3.bf16.msra.mxu0 %v2681_v7  ;;  %2130 = vmatprep.mubr.msk.f32.mxu0 %vm2577_vm0, %v2578_v2 }
 0x5e9   :  { %2301 = vmatprep.subr.bf16.mxu0 %v2576_v1 }
 0x5ec   :  { %2303 = vmatpush3.bf16.msra.mxu0 %v2687_v10 }
 0x5ed   :  { %2310 = vmatprep.subr.bf16.mxu0 %v2576_v1 }
 0x6ba   :  { %v414_v3 = vpop.f32.mrb[2].mxu0 }
 0x6bb   :  { %v418_v4 = vadd.f32 %v414_v3, %v105_v0  ;;  %v2110_v5 = vpop.f32.mrb[3].mxu0 }
 0x6bd   :  { %v1934_v6 = vmul.f32 -1.442695, %v418_v4 }
 0x6bf   :  { %2417 = vpow2.f32 %v1934_v6 }
 0x6c9   :  { %v2418_v8 = vpop.eup %2417 }
 0x6ca   :  { %v422_v11 = vadd.f32 1.0, %v2418_v8 }
 0x6cc   :  { %2419 = vrcp.f32 %v422_v11 }
 0x6d6   :  { %v2420_v13 = vpop.eup %2419 }
 0x6d7   :  { %v425_v15 = vmul.f32 2.0, %v2420_v13 }
 0x6d9   :  { %v1935_v16 = vadd.f32 -1.0, %v425_v15 }
 0x6db   :  { %v427_v17 = vsel %vm2715_vm3, %v1935_v16, %v2420_v13  ;;  %v2586_v16 = vmov 5  }
 0x6dc   :  { %430 = vrot.lane.b32.xlu1 %v427_v17, %s2580_s1  ;;  %v428_v20 = vmul.f32 %v427_v17, %v336_v56 }
 0x74e   :  { %v431_v18 = vpop.permute.xlu1 %430 }
 0x74f   :  { %v433_v19 = vmul.f32 %v431_v18, %v427_v17 }
 0x751   :  { %435 = vrot.lane.b32.xlu1 %v433_v19, %s2581_s17 }
 0x7c3   :  { %v436_v21 = vpop.permute.xlu1 %435 }
 0x7c4   :  { %v438_v22 = vadd.f32 %v436_v21, %v428_v20 }
 0x7c6   :  { %2421 = vtanh.f32 %v438_v22 }
 0x7d0   :  { %v2422_v23 = vpop.eup %2421 }
 0x7d1   :  { %441 = vrot.lane.b32.xlu0 %v2422_v23, %s2580_s1 }
 0x7d5   :  { %107 = vperm.xlu0 %2400, %v2683_v9  }
 0x7d9   :  { %2401 = vset.pattern.permute.xlu0 %v2585_v49 }
 0x843   :  { %v442_v25 = vpop.permute.xlu0 %441 }
 0x844   :  { %v444_v27 = vmul.f32 %v442_v25, %v427_v17 }
 0x846   :  { %446 = vrot.lane.b32.xlu1 %v444_v27, %s2581_s17 }
 0x854   :  { %v108_v29 = vpop.permute.xlu0 %107 }
 0x855   :  { %v110_v30 = vmul.f32 %v2706_v12, %v108_v29 }
 0x857   :  { %v111_v31 = vadd.f32 %v2712_v14, %v110_v30 }
 0x8b8   :  { %v2764_v28 = vpop.permute.xlu1 %446 }
 0x8b9   :  { %2120 = vmatmul.mubr.msk.f32.vlgmr.msra.gmra.mrb[2].mxu1 %vm140_vm4, %v2764_v28 }
 0x8ba   :  { %2306 = vmatpush3.bf16.msra.mxu1 %v2681_v7  ;;  %2141 = vmatprep.mubr.msk.f32.mxu1 %vm2577_vm0, %v2578_v2 }
 0x8bb   :  { %2307 = vmatprep.subr.bf16.mxu1 %v2576_v1 }
 0x8be   :  { %2309 = vmatpush3.bf16.msra.mxu1 %v2687_v10 }
 0x8bf   :  { %2316 = vmatprep.subr.bf16.mxu1 %v2576_v1 }
 0x98c   :  { %v516_v32 = vpop.f32.mrb[2].mxu1 }
 0x98d   :  { %v520_v33 = vadd.f32 %v516_v32, %v111_v31  ;;  %v2121_v34 = vpop.f32.mrb[3].mxu1 }
 0x98f   :  { %v1937_v35 = vmul.f32 -1.442695, %v520_v33 }
 0x991   :  { %2423 = vpow2.f32 %v1937_v35 }
 0x99b   :  { %v2424_v36 = vpop.eup %2423 }
 0x99c   :  { %v524_v37 = vadd.f32 1.0, %v2424_v36 }
 0x99e   :  { %2425 = vrcp.f32 %v524_v37 }
 0x9a8   :  { %v2426_v39 = vpop.eup %2425 }
 0x9a9   :  { %v527_v40 = vmul.f32 2.0, %v2426_v39 }
 0x9ab   :  { %v1938_v41 = vadd.f32 -1.0, %v527_v40  ;;  %v956_v40 = vld [vmem:[#allocation7 + $0x8] sm:$0xff] }
 0x9ad   :  { %v529_v42 = vsel %vm2715_vm3, %v1938_v41, %v2426_v39  ;;  %v955_v39 = vld [vmem:[#allocation7] sm:$0xff] }
 0x9ae   :  { %532 = vrot.lane.b32.xlu1 %v529_v42, %s2580_s1  ;;  %v530_v45 = vmul.f32 %v529_v42, %v438_v22  ;;  %v2322_v41 = vpack.c.bf16 %v956_v40, %v955_v39 }
 0xa20   :  { %v533_v43 = vpop.permute.xlu1 %532 }
 0xa21   :  { %v535_v44 = vmul.f32 %v533_v43, %v529_v42 }
 0xa23   :  { %537 = vrot.lane.b32.xlu1 %v535_v44, %s2581_s17 }
 0xa95   :  { %v538_v46 = vpop.permute.xlu1 %537 }
 0xa96   :  { %v540_v47 = vadd.f32 %v538_v46, %v530_v45  ;;  %v2587_v45 = vmov 6   ;;  %v957_v46 = vld [vmem:[#allocation7 + $0x10] sm:$0xff] }
 0xa98   :  { %2427 = vtanh.f32 %v540_v47 }
 0xaa2   :  { %v2428_v48 = vpop.eup %2427 }
 0xaa3   :  { %543 = vrot.lane.b32.xlu0 %v2428_v48, %s2580_s1 }
 0xaa7   :  { %113 = vperm.xlu0 %2401, %v2683_v9  }
 0xaab   :  { %2402 = vset.pattern.permute.xlu0 %v2586_v16  ;;  %v1078_v16 = vld [vmem:[#allocation5 + $0x20] sm:$0xff] }
 0xb15   :  { %v544_v50 = vpop.permute.xlu0 %543 }
 0xb16   :  { %v546_v51 = vmul.f32 %v544_v50, %v529_v42 }
 0xb18   :  { %548 = vrot.lane.b32.xlu1 %v546_v51, %s2581_s17 }
 0xb26   :  { %v114_v53 = vpop.permute.xlu0 %113 }
 0xb27   :  { %v116_v54 = vmul.f32 %v2706_v12, %v114_v53 }
 0xb29   :  { %v117_v55 = vadd.f32 %v2712_v14, %v116_v54 }
 0xb8a   :  { %v2783_v52 = vpop.permute.xlu1 %548 }
 0xb8b   :  { %2131 = vmatmul.mubr.msk.f32.vlgmr.msra.gmra.mrb[4].mxu0 %vm140_vm4, %v2783_v52 }
 0xb8c   :  { %2312 = vmatpush3.bf16.msra.mxu0 %v2681_v7  ;;  %2152 = vmatprep.mubr.msk.f32.mxu0 %vm2577_vm0, %v2578_v2 }
 0xb8d   :  { %2313 = vmatprep.subr.bf16.mxu0 %v2576_v1 }
 0xb90   :  { %2315 = vmatpush3.bf16.msra.mxu0 %v2687_v10 }
 0xb91   :  { %2323 = vmatprep.subr.bf16.mxu0 %v2322_v41 }
 0xc5e   :  { %v618_v56 = vpop.f32.mrb[4].mxu0 }
 0xc5f   :  { %v622_v57 = vadd.f32 %v618_v56, %v117_v55  ;;  %v2132_v58 = vpop.f32.mrb[5].mxu0 }
 0xc61   :  { %v1940_v59 = vmul.f32 -1.442695, %v622_v57 }
 0xc63   :  { %2429 = vpow2.f32 %v1940_v59 }
 0xc6d   :  { %v2430_v60 = vpop.eup %2429 }
 0xc6e   :  { %v626_v62 = vadd.f32 1.0, %v2430_v60 }
 0xc70   :  { %2431 = vrcp.f32 %v626_v62 }
 0xc7a   :  { %v2432_v63 = vpop.eup %2431 }
 0xc7b   :  { %v629_v0 = vmul.f32 2.0, %v2432_v63 }
 0xc7d   :  { %v1941_v3 = vadd.f32 -1.0, %v629_v0 }
 0xc7f   :  { %v631_v4 = vsel %vm2715_vm3, %v1941_v3, %v2432_v63 }
 0xc80   :  { %634 = vrot.lane.b32.xlu1 %v631_v4, %s2580_s1  ;;  %v632_v8 = vmul.f32 %v631_v4, %v540_v47  ;;  %v958_v47 = vld [vmem:[#allocation7 + $0x18] sm:$0xff] }
 0xc81   :  { %v2326_v48 = vpack.c.bf16 %v958_v47, %v957_v46 }
 0xcf2   :  { %v635_v5 = vpop.permute.xlu1 %634 }
 0xcf3   :  { %v637_v6 = vmul.f32 %v635_v5, %v631_v4 }
 0xcf5   :  { %639 = vrot.lane.b32.xlu1 %v637_v6, %s2581_s17 }
 0xd67   :  { %v640_v11 = vpop.permute.xlu1 %639 }
 0xd68   :  { %v642_v13 = vadd.f32 %v640_v11, %v632_v8 }
 0xd6a   :  { %2433 = vtanh.f32 %v642_v13 }
 0xd74   :  { %v2434_v15 = vpop.eup %2433 }
 0xd75   :  { %645 = vrot.lane.b32.xlu0 %v2434_v15, %s2580_s1 }
 0xd79   :  { %119 = vperm.xlu0 %2402, %v2683_v9  }
 0xd7d   :  { %2403 = vset.pattern.permute.xlu0 %v2587_v45 }
 0xde7   :  { %v646_v17 = vpop.permute.xlu0 %645 }
 0xde8   :  { %v648_v18 = vmul.f32 %v646_v17, %v631_v4  ;;  %v1079_v17 = vld [vmem:[#allocation5 + $0x28] sm:$0xff] }
 0xdea   :  { %650 = vrot.lane.b32.xlu1 %v648_v18, %s2581_s17  ;;  %v2849_v18 = vpack.c.bf16 %v1079_v17, %v1078_v16 }
 0xdf8   :  { %v120_v20 = vpop.permute.xlu0 %119 }
 0xdf9   :  { %v122_v21 = vmul.f32 %v2706_v12, %v120_v20  ;;  %v1081_v20 = vld [vmem:[#allocation5 + $0x38] sm:$0xff] }
 0xdfb   :  { %v123_v22 = vadd.f32 %v2712_v14, %v122_v21 }
 0xe5c   :  { %v651_v19 = vpop.permute.xlu1 %650 }
 0xe5d   :  { %2142 = vmatmul.mubr.msk.f32.vlgmr.msra.gmra.mrb[4].mxu1 %vm140_vm4, %v651_v19 }
 0xe5e   :  { %2318 = vmatpush3.bf16.msra.mxu1 %v2681_v7  ;;  %2163 = vmatprep.mubr.msk.f32.mxu1 %vm2577_vm0, %v2578_v2 }
 0xe5f   :  { %2319 = vmatprep.subr.bf16.mxu1 %v2576_v1 }
 0xe62   :  { %2321 = vmatpush3.bf16.msra.mxu1 %v2687_v10 }
 0xe63   :  { %2330 = vmatprep.subr.bf16.mxu1 %v2576_v1 }
 0xf30   :  { %v720_v23 = vpop.f32.mrb[4].mxu1 }
 0xf31   :  { %v724_v24 = vadd.f32 %v720_v23, %v123_v22  ;;  %v2143_v25 = vpop.f32.mrb[5].mxu1 }
 0xf33   :  { %v1943_v27 = vmul.f32 -1.442695, %v724_v24 }
 0xf35   :  { %2435 = vpow2.f32 %v1943_v27 }
 0xf3f   :  { %v2436_v7 = vpop.eup %2435 }
 0xf40   :  { %v728_v29 = vadd.f32 1.0, %v2436_v7  ;;  %v2876_v7 = vld [vmem:[%s3004_s4 + $0x1] ss:$0 sm:$0xff] }
 0xf42   :  { %2437 = vrcp.f32 %v728_v29 }
 0xf4c   :  { %v2438_v30 = vpop.eup %2437 }
 0xf4d   :  { %v731_v31 = vmul.f32 2.0, %v2438_v30 }
 0xf4f   :  { %v1944_v32 = vadd.f32 -1.0, %v731_v31 }
 0xf51   :  { %v733_v10 = vsel %vm2715_vm3, %v1944_v32, %v2438_v30 }
 0xf52   :  { %736 = vrot.lane.b32.xlu1 %v733_v10, %s2580_s1  ;;  %v734_v35 = vmul.f32 %v733_v10, %v642_v13 }
 0xfc4   :  { %v737_v33 = vpop.permute.xlu1 %736 }
 0xfc5   :  { %v739_v34 = vmul.f32 %v737_v33, %v733_v10 }
 0xfc7   :  { %741 = vrot.lane.b32.xlu1 %v739_v34, %s2581_s17 }
0x1039   :  { %v742_v36 = vpop.permute.xlu1 %741 }
0x103a   :  { %v744_v37 = vadd.f32 %v742_v36, %v734_v35 }
0x103c   :  { %2439 = vtanh.f32 %v744_v37 }
0x1046   :  { %v2440_v42 = vpop.eup %2439 }
0x1047   :  { %747 = vrot.lane.b32.xlu0 %v2440_v42, %s2580_s1  ;;  %v2588_v42 = vmov 7  }
0x104b   :  { %125 = vperm.xlu0 %2403, %v2683_v9  }
0x104f   :  { %2404 = vset.pattern.permute.xlu0 %v2588_v42 }
0x10b9   :  { %v748_v43 = vpop.permute.xlu0 %747 }
0x10ba   :  { %v750_v44 = vmul.f32 %v748_v43, %v733_v10 }
0x10bc   :  { %752 = vrot.lane.b32.xlu1 %v750_v44, %s2581_s17 }
0x10ca   :  { %v126_v50 = vpop.permute.xlu0 %125 }
0x112e   :  { %v753_v49 = vpop.permute.xlu1 %752 }
0x112f   :  { %2153 = vmatmul.mubr.msk.f32.vlgmr.msra.gmra.mrb[6].mxu0 %vm140_vm4, %v753_v49 }
0x1130   :  { %2325 = vmatpush3.bf16.msra.mxu0 %v2322_v41  ;;  %2174 = vmatprep.mubr.msk.f32.mxu0 %vm140_vm4, %v2726_v38  ;;  %v128_v38 = vmul.f32 %v2706_v12, %v126_v50 }
0x1131   :  { %2327 = vmatprep.subr.bf16.mxu0 %v2326_v48 }
0x1132   :  { %v129_v51 = vadd.f32 %v2712_v14, %v128_v38 }
0x1134   :  { %2329 = vmatpush3.bf16.msra.mxu0 %v2326_v48 }
0x1135   :  { %2342 = vmatprep.subr.bf16.mxu0 %v2576_v1 }
0x1137   :  { %2175 = vmatmul.mubr.msk.f32.vlgmr.msra.gmra.mrb[8].mxu0 %vm140_vm4, %v2745_v61 }
0x1138   :  { %2177 = vmatprep.mubr.msk.f32.mxu0 %vm140_vm4, %v2764_v28  ;;  %2344 = vmatpush3.bf16.msra.mxu0 %v2849_v18 }
0x1139   :  { %2345 = vmatprep.subr.bf16.mxu0 %v2576_v1 }
0x113b   :  { %2178 = vmatmul.mubr.msk.f32.gmra.mrb[10].mxu0 %vm140_vm4, %v2783_v52 }
0x113c   :  { %2180 = vmatprep.mubr.msk.f32.mxu0 %vm140_vm4, %v651_v19  ;;  %v1080_v19 = vld [vmem:[#allocation5 + $0x30] sm:$0xff] }
0x113d   :  { %v2853_v21 = vpack.c.bf16 %v1081_v20, %v1080_v19 }
0x113f   :  { %2181 = vmatmul.mubr.msk.f32.gmra.mrb[12].mxu0 %vm140_vm4, %v753_v49 }
0x1140   :  { %2347 = vmatpush3.bf16.msra.mxu0 %v2853_v21 }
0x1141   :  { %2354 = vmatprep.subr.bf16.mxu0 %v2576_v1 }
0x1202   :  { %v822_v53 = vpop.f32.mrb[6].mxu0 }
0x1203   :  { %v826_v54 = vadd.f32 %v822_v53, %v129_v51  ;;  %v2154_v55 = vpop.f32.mrb[7].mxu0 }
0x1205   :  { %v1946_v56 = vmul.f32 -1.442695, %v826_v54 }
0x1207   :  { %2441 = vpow2.f32 %v1946_v56 }
0x120a   :  { %v2831_v61 = vpop.f32.mrb[8].mxu0 }
0x120b   :  { %v1038_v28 = vpop.f32.mrb[9].mxu0 }
0x120c   :  { %v1039_v29 = vadd.f32 %v2876_v7, %v1038_v28 }
0x120e   :  { %v2833_v57 = vpop.f32.mrb[10].mxu0 }
0x120f   :  { %v2835_v52 = vpop.f32.mrb[11].mxu0 }
0x1211   :  { %v2442_v58 = vpop.eup %2441 }
0x1212   :  { %v830_v59 = vadd.f32 1.0, %v2442_v58  ;;  %v2837_v60 = vpop.f32.mrb[12].mxu0 }
0x1213   :  { %v2839_v62 = vpop.f32.mrb[13].mxu0 }
0x1214   :  { %2443 = vrcp.f32 %v830_v59 }
0x121e   :  { %v2444_v63 = vpop.eup %2443 }
0x121f   :  { %v833_v0 = vmul.f32 2.0, %v2444_v63 }
0x1221   :  { %v1947_v3 = vadd.f32 -1.0, %v833_v0 }
0x1223   :  { %v835_v4 = vsel %vm2715_vm3, %v1947_v3, %v2444_v63 }
0x1224   :  { %838 = vrot.lane.b32.xlu1 %v835_v4, %s2580_s1  ;;  %v836_v8 = vmul.f32 %v835_v4, %v744_v37 }
0x1296   :  { %v839_v5 = vpop.permute.xlu1 %838 }
0x1297   :  { %v841_v6 = vmul.f32 %v839_v5, %v835_v4  ;;  %v1044_v5 = vadd.f32 %v2831_v61, %v2876_v7 }
0x1299   :  { %843 = vrot.lane.b32.xlu1 %v841_v6, %s2581_s17 }
0x130b   :  { %v844_v11 = vpop.permute.xlu1 %843 }
0x130c   :  { %v2845_v13 = vadd.f32 %v844_v11, %v836_v8 }
0x130e   :  { %2445 = vtanh.f32 %v2845_v13 }
0x1318   :  { %v2446_v15 = vpop.eup %2445 }
0x1319   :  { %849 = vrot.lane.b32.xlu0 %v2446_v15, %s2580_s1 }
0x138b   :  { %v850_v22 = vpop.permute.xlu0 %849 }
0x138c   :  { %v852_v23 = vmul.f32 %v850_v22, %v835_v4 }
0x138e   :  { %854 = vrot.lane.b32.xlu1 %v852_v23, %s2581_s17 }
0x1400   :  { %v855_v24 = vpop.permute.xlu1 %854 }
0x1401   :  { %2164 = vmatmul.mubr.msk.f32.vlgmr.msra.gmra.mrb[6].mxu1 %vm140_vm4, %v855_v24  ;;  %2183 = vmatprep.mubr.msk.f32.mxu0 %vm140_vm4, %v855_v24 }
0x1402   :  { %2332 = vmatpush3.bf16.msra.mxu1 %v2849_v18  ;;  %2194 = vmatprep.mubr.msk.f32.mxu1 %vm2577_vm0, %v2578_v2 }
0x1403   :  { %2333 = vmatprep.subr.bf16.mxu1 %v2576_v1 }
0x1406   :  { %2335 = vmatpush3.bf16.msra.mxu1 %v2853_v21 }
0x1407   :  { %2336 = vmatprep.subr.bf16.mxu1 %v2576_v1 }
0x1409   :  { %2195 = vmatmul.mubr.f32.vlgmr.msra.gmra.mrb[8].mxu1 %v2578_v2 }
0x140a   :  { %2338 = vmatpush3.bf16.msra.mxu1 %v2849_v18  ;;  %2205 = vmatprep.mubr.msk.f32.mxu1 %vm2577_vm0, %v2578_v2 }
0x140b   :  { %2339 = vmatprep.subr.bf16.mxu1 %v2576_v1 }
0x140e   :  { %2341 = vmatpush3.bf16.msra.mxu1 %v2853_v21 }
0x140f   :  { %2348 = vmatprep.subr.bf16.mxu1 %v2576_v1 }
0x14d4   :  { %v924_v25 = vpop.f32.mrb[6].mxu1 }
0x14d5   :  { %v2165_v27 = vpop.f32.mrb[7].mxu1 }
0x14dc   :  { %v1148_v30 = vpop.f32.mrb[8].mxu1 }
0x14dd   :  { %v1152_v31 = vadd.f32 %v1148_v30, %v1039_v29  ;;  %v2196_v32 = vpop.f32.mrb[9].mxu1 }
0x14df   :  { %v1961_v10 = vmul.f32 -1.442695, %v1152_v31 }
0x14e1   :  { %2447 = vpow2.f32 %v1961_v10 }
0x14eb   :  { %v2448_v33 = vpop.eup %2447 }
0x14ec   :  { %v1156_v34 = vadd.f32 1.0, %v2448_v33 }
0x14ee   :  { %2449 = vrcp.f32 %v1156_v34 }
0x14f8   :  { %v2450_v35 = vpop.eup %2449 }
0x14f9   :  { %v1159_v36 = vmul.f32 2.0, %v2450_v35 }
0x14fb   :  { %v1962_v37 = vadd.f32 -1.0, %v1159_v36 }
0x14fd   :  { %v1161_v39 = vsel %vm2715_vm3, %v1962_v37, %v2450_v35  ;;  %v1049_v37 = vadd.f32 %v2876_v7, %v2835_v52 }
0x14fe   :  { %1164 = vrot.lane.b32.xlu0 %v1161_v39, %s2580_s1  ;;  %v1162_v43 = vmul.f32 0.0, %v1161_v39 }
0x1570   :  { %v1165_v40 = vpop.permute.xlu0 %1164 }
0x1571   :  { %v1167_v41 = vmul.f32 %v1165_v40, %v1161_v39 }
0x1573   :  { %1169 = vrot.lane.b32.xlu1 %v1167_v41, %s2581_s17 }
0x15e5   :  { %v1170_v44 = vpop.permute.xlu1 %1169 }
0x15e6   :  { %v1172_v45 = vadd.f32 %v1170_v44, %v1162_v43 }
0x15e8   :  { %2451 = vtanh.f32 %v1172_v45 }
0x15f2   :  { %v2452_v46 = vpop.eup %2451 }
0x15f3   :  { %1175 = vrot.lane.b32.xlu0 %v2452_v46, %s2580_s1 }
0x15f7   :  { %131 = vperm.xlu0 %2404, %v2683_v9  }
0x1665   :  { %v1176_v47 = vpop.permute.xlu0 %1175 }
0x1666   :  { %v1178_v48 = vmul.f32 %v1176_v47, %v1161_v39 }
0x1668   :  { %1180 = vrot.lane.b32.xlu1 %v1178_v48, %s2581_s17 }
0x1676   :  { %v132_v49 = vpop.permute.xlu0 %131 }
0x1677   :  { %v134_v50 = vmul.f32 %v2706_v12, %v132_v49 }
0x1679   :  { %v135_v38 = vadd.f32 %v2712_v14, %v134_v50 }
0x167b   :  { %v928_v51 = vadd.f32 %v924_v25, %v135_v38 }
0x167d   :  { %v1949_v53 = vmul.f32 -1.442695, %v928_v51 }
0x167f   :  { %2453 = vpow2.f32 %v1949_v53 }
0x1689   :  { %v2454_v54 = vpop.eup %2453 }
0x168a   :  { %v932_v55 = vadd.f32 1.0, %v2454_v54 }
0x168c   :  { %2455 = vrcp.f32 %v932_v55 }
0x1696   :  { %v2456_v56 = vpop.eup %2455 }
0x1697   :  { %v935_v28 = vmul.f32 2.0, %v2456_v56 }
0x1699   :  { %v1950_v58 = vadd.f32 -1.0, %v935_v28  ;;  %v1054_v28 = vadd.f32 %v2833_v57, %v2876_v7 }
0x169b   :  { %v937_v9 = vsel %vm2715_vm3, %v1950_v58, %v2456_v56 }
0x169c   :  { %940 = vrot.lane.b32.xlu1 %v937_v9, %s2580_s1  ;;  %v938_v63 = vmul.f32 %v937_v9, %v2845_v13 }
0x16da   :  { %v1181_v59 = vpop.permute.xlu1 %1180 }
0x16db   :  { %2206 = vmatmul.mubr.msk.f32.vlgmr.msra.gmra.mrb[10].mxu1 %vm140_vm4, %v1181_v59 }
0x16dc   :  { %2350 = vmatpush3.bf16.msra.mxu1 %v2849_v18  ;;  %2227 = vmatprep.mubr.msk.f32.mxu1 %vm2577_vm0, %v2578_v2 }
0x16dd   :  { %2351 = vmatprep.subr.bf16.mxu1 %v2576_v1 }
0x16e0   :  { %2353 = vmatpush3.bf16.msra.mxu1 %v2853_v21 }
0x16e1   :  { %2360 = vmatprep.subr.bf16.mxu1 %v2576_v1 }
0x170e   :  { %v941_v12 = vpop.permute.xlu1 %940 }
0x170f   :  { %v943_v14 = vmul.f32 %v941_v12, %v937_v9 }
0x1711   :  { %945 = vrot.lane.b32.xlu0 %v943_v14, %s2581_s17 }
0x1783   :  { %v946_v0 = vpop.permute.xlu0 %945 }
0x1784   :  { %v948_v3 = vadd.f32 %v946_v0, %v938_v63 }
0x1786   :  { %2457 = vtanh.f32 %v948_v3 }
0x1790   :  { %v2458_v4 = vpop.eup %2457 }
0x1791   :  { %951 = vrot.lane.b32.xlu0 %v2458_v4, %s2580_s1 }
0x17ae   :  { %v1250_v6 = vpop.f32.mrb[10].mxu1 }
0x17af   :  { %v1254_v8 = vadd.f32 %v1250_v6, %v1044_v5  ;;  %v2207_v11 = vpop.f32.mrb[11].mxu1 }
0x17b1   :  { %v1964_v15 = vmul.f32 -1.442695, %v1254_v8 }
0x17b3   :  { %2459 = vpow2.f32 %v1964_v15 }
0x17bd   :  { %v2460_v16 = vpop.eup %2459 }
0x17be   :  { %v1258_v17 = vadd.f32 1.0, %v2460_v16 }
0x17c0   :  { %2461 = vrcp.f32 %v1258_v17 }
0x17ca   :  { %v2462_v19 = vpop.eup %2461 }
0x17cb   :  { %v1261_v20 = vmul.f32 2.0, %v2462_v19 }
0x17cd   :  { %v1965_v13 = vadd.f32 -1.0, %v1261_v20 }
0x17cf   :  { %v1263_v22 = vsel %vm2715_vm3, %v1965_v13, %v2462_v19  ;;  %v1059_v13 = vadd.f32 %v2876_v7, %v2839_v62 }
0x17d0   :  { %1266 = vrot.lane.b32.xlu1 %v1263_v22, %s2580_s1  ;;  %v1264_v29 = vmul.f32 %v1263_v22, %v1172_v45 }
0x1803   :  { %v952_v23 = vpop.permute.xlu0 %951 }
0x1804   :  { %v954_v24 = vmul.f32 %v952_v23, %v937_v9 }
0x1806   :  { %968 = vrot.lane.b32.xlu0 %v954_v24, %s2581_s17 }
0x1842   :  { %v1267_v61 = vpop.permute.xlu1 %1266 }
0x1843   :  { %v1269_v25 = vmul.f32 %v1267_v61, %v1263_v22 }
0x1845   :  { %1271 = vrot.lane.b32.xlu1 %v1269_v25, %s2581_s17 }
0x1878   :  { %v969_v27 = vpop.permute.xlu0 %968 }
0x1879   :  { %2184 = vmatmul.mubr.msk.f32.gmra.mrb[14].mxu0 %vm140_vm4, %v969_v27 }
0x187a   :  { %2216 = vmatprep.mubr.msk.f32.mxu0 %vm2577_vm0, %v2578_v2 }
0x18b7   :  { %v1272_v30 = vpop.permute.xlu1 %1271 }
0x18b8   :  { %v1274_v31 = vadd.f32 %v1272_v30, %v1264_v29 }
0x18ba   :  { %2463 = vtanh.f32 %v1274_v31 }
0x18c4   :  { %v2464_v32 = vpop.eup %2463 }
0x18c5   :  { %1277 = vrot.lane.b32.xlu1 %v2464_v32, %s2580_s1 }
0x1937   :  { %v1278_v10 = vpop.permute.xlu1 %1277 }
0x1938   :  { %v1280_v33 = vmul.f32 %v1278_v10, %v1263_v22 }
0x193a   :  { %1282 = vrot.lane.b32.xlu1 %v1280_v33, %s2581_s17 }
0x194c   :  { %v2913_v34 = vpop.f32.mrb[14].mxu0 }
0x194d   :  { %v2915_v35 = vpop.f32.mrb[15].mxu0 }
0x19ac   :  { %v1283_v36 = vpop.permute.xlu1 %1282 }
0x19ad   :  { %2217 = vmatmul.mubr.msk.f32.vlgmr.msra.gmra.mrb[16].mxu0 %vm140_vm4, %v1283_v36 }
0x19ae   :  { %2356 = vmatpush3.bf16.msra.mxu0 %v2849_v18  ;;  %2238 = vmatprep.mubr.msk.f32.mxu0 %vm2577_vm0, %v2578_v2 }
0x19af   :  { %2357 = vmatprep.subr.bf16.mxu0 %v2576_v1 }
0x19b2   :  { %2359 = vmatpush3.bf16.msra.mxu0 %v2853_v21 }
0x19b3   :  { %2366 = vmatprep.subr.bf16.mxu0 %v2576_v1 }
0x1a80   :  { %v1352_v39 = vpop.f32.mrb[16].mxu0 }
0x1a81   :  { %v1356_v40 = vadd.f32 %v1352_v39, %v1049_v37  ;;  %v2218_v41 = vpop.f32.mrb[17].mxu0 }
0x1a83   :  { %v1967_v42 = vmul.f32 -1.442695, %v1356_v40 }
0x1a85   :  { %2465 = vpow2.f32 %v1967_v42 }
0x1a8f   :  { %v2466_v43 = vpop.eup %2465 }
0x1a90   :  { %v1360_v44 = vadd.f32 1.0, %v2466_v43  ;;  %v1064_v43 = vadd.f32 %v2837_v60, %v2876_v7 }
0x1a92   :  { %2467 = vrcp.f32 %v1360_v44 }
0x1a9c   :  { %v2468_v45 = vpop.eup %2467 }
0x1a9d   :  { %v1363_v46 = vmul.f32 2.0, %v2468_v45 }
0x1a9f   :  { %v1968_v47 = vadd.f32 -1.0, %v1363_v46 }
0x1aa1   :  { %v1365_v48 = vsel %vm2715_vm3, %v1968_v47, %v2468_v45 }
0x1aa2   :  { %1368 = vrot.lane.b32.xlu0 %v1365_v48, %s2580_s1  ;;  %v1366_v52 = vmul.f32 %v1365_v48, %v1274_v31 }
0x1b14   :  { %v1369_v49 = vpop.permute.xlu0 %1368 }
0x1b15   :  { %v1371_v50 = vmul.f32 %v1369_v49, %v1365_v48 }
0x1b17   :  { %1373 = vrot.lane.b32.xlu1 %v1371_v50, %s2581_s17 }
0x1b89   :  { %v1374_v38 = vpop.permute.xlu1 %1373 }
0x1b8a   :  { %v1376_v51 = vadd.f32 %v1374_v38, %v1366_v52 }
0x1b8c   :  { %2469 = vtanh.f32 %v1376_v51 }
0x1b96   :  { %v2470_v53 = vpop.eup %2469 }
0x1b97   :  { %1379 = vrot.lane.b32.xlu0 %v2470_v53, %s2580_s1 }
0x1c09   :  { %v1380_v54 = vpop.permute.xlu0 %1379 }
0x1c0a   :  { %v1382_v55 = vmul.f32 %v1380_v54, %v1365_v48 }
0x1c0c   :  { %1384 = vrot.lane.b32.xlu1 %v1382_v55, %s2581_s17 }
0x1c7e   :  { %v1385_v56 = vpop.permute.xlu1 %1384 }
0x1c7f   :  { %2228 = vmatmul.mubr.msk.f32.vlgmr.msra.gmra.mrb[12].mxu1 %vm140_vm4, %v1385_v56 }
0x1c80   :  { %2362 = vmatpush3.bf16.msra.mxu1 %v2849_v18  ;;  %2249 = vmatprep.mubr.msk.f32.mxu1 %vm2577_vm0, %v2578_v2 }
0x1c81   :  { %2363 = vmatprep.subr.bf16.mxu1 %v2576_v1 }
0x1c84   :  { %2365 = vmatpush3.bf16.msra.mxu1 %v2853_v21 }
0x1c85   :  { %2372 = vmatprep.subr.bf16.mxu1 %v2576_v1 }
0x1d52   :  { %v1454_v58 = vpop.f32.mrb[12].mxu1 }
0x1d53   :  { %v1458_v9 = vadd.f32 %v1454_v58, %v1054_v28  ;;  %v2229_v59 = vpop.f32.mrb[13].mxu1  ;;  %v1069_v28 = vadd.f32 %v2876_v7, %v2915_v35 }
0x1d55   :  { %v1970_v12 = vmul.f32 -1.442695, %v1458_v9 }
0x1d57   :  { %2471 = vpow2.f32 %v1970_v12 }
0x1d61   :  { %v2472_v14 = vpop.eup %2471 }
0x1d62   :  { %v1462_v63 = vadd.f32 1.0, %v2472_v14 }
0x1d64   :  { %2473 = vrcp.f32 %v1462_v63 }
0x1d6e   :  { %v2474_v0 = vpop.eup %2473 }
0x1d6f   :  { %v1465_v3 = vmul.f32 2.0, %v2474_v0 }
0x1d71   :  { %v1971_v4 = vadd.f32 -1.0, %v1465_v3 }
0x1d73   :  { %v1467_v5 = vsel %vm2715_vm3, %v1971_v4, %v2474_v0 }
0x1d74   :  { %1470 = vrot.lane.b32.xlu0 %v1467_v5, %s2580_s1  ;;  %v1468_v57 = vmul.f32 %v1467_v5, %v1376_v51 }
0x1de6   :  { %v1471_v6 = vpop.permute.xlu0 %1470 }
0x1de7   :  { %v1473_v8 = vmul.f32 %v1471_v6, %v1467_v5 }
0x1de9   :  { %1475 = vrot.lane.b32.xlu1 %v1473_v8, %s2581_s17 }
0x1e5b   :  { %v1476_v11 = vpop.permute.xlu1 %1475 }
0x1e5c   :  { %v1478_v15 = vadd.f32 %v1476_v11, %v1468_v57 }
0x1e5e   :  { %2475 = vtanh.f32 %v1478_v15 }
0x1e68   :  { %v2476_v16 = vpop.eup %2475 }
0x1e69   :  { %1481 = vrot.lane.b32.xlu0 %v2476_v16, %s2580_s1 }
0x1edb   :  { %v1482_v17 = vpop.permute.xlu0 %1481 }
0x1edc   :  { %v1484_v19 = vmul.f32 %v1482_v17, %v1467_v5 }
0x1ede   :  { %1486 = vrot.lane.b32.xlu1 %v1484_v19, %s2581_s17 }
0x1f50   :  { %v1487_v20 = vpop.permute.xlu1 %1486 }
0x1f51   :  { %2239 = vmatmul.mubr.msk.f32.vlgmr.msra.gmra.mrb[18].mxu0 %vm140_vm4, %v1487_v20  ;;  %v1074_v20 = vadd.f32 %v2913_v34, %v2876_v7  ;;  %v1984_v7 = vld [vmem:[%s3005_s5] ss:$0 sm:$0xff] }
0x1f52   :  { %2368 = vmatpush3.bf16.msra.mxu0 %v2849_v18  ;;  %2260 = vmatprep.mubr.msk.f32.mxu0 %vm2577_vm0, %v2578_v2 }
0x1f53   :  { %2369 = vmatprep.subr.bf16.mxu0 %v2576_v1 }
0x1f56   :  { %2371 = vmatpush3.bf16.msra.mxu0 %v2853_v21 }
0x2024   :  { %v1556_v22 = vpop.f32.mrb[18].mxu0 }
0x2025   :  { %v1560_v23 = vadd.f32 %v1556_v22, %v1059_v13  ;;  %v2240_v24 = vpop.f32.mrb[19].mxu0 }
0x2027   :  { %v1973_v61 = vmul.f32 -1.442695, %v1560_v23 }
0x2029   :  { %2477 = vpow2.f32 %v1973_v61 }
0x2033   :  { %v2478_v25 = vpop.eup %2477 }
0x2034   :  { %v1564_v27 = vadd.f32 1.0, %v2478_v25 }
0x2036   :  { %2479 = vrcp.f32 %v1564_v27 }
0x2040   :  { %v2480_v29 = vpop.eup %2479 }
0x2041   :  { %v1567_v30 = vmul.f32 2.0, %v2480_v29 }
0x2043   :  { %v1974_v31 = vadd.f32 -1.0, %v1567_v30 }
0x2045   :  { %v1569_v32 = vsel %vm2715_vm3, %v1974_v31, %v2480_v29 }
0x2046   :  { %1572 = vrot.lane.b32.xlu0 %v1569_v32, %s2580_s1  ;;  %v1570_v62 = vmul.f32 %v1569_v32, %v1478_v15 }
0x20b8   :  { %v1573_v10 = vpop.permute.xlu0 %1572 }
0x20b9   :  { %v1575_v33 = vmul.f32 %v1573_v10, %v1569_v32 }
0x20bb   :  { %1577 = vrot.lane.b32.xlu1 %v1575_v33, %s2581_s17 }
0x212d   :  { %v1578_v36 = vpop.permute.xlu1 %1577 }
0x212e   :  { %v1580_v37 = vadd.f32 %v1578_v36, %v1570_v62 }
0x2130   :  { %2481 = vtanh.f32 %v1580_v37 }
0x213a   :  { %v2482_v39 = vpop.eup %2481 }
0x213b   :  { %1583 = vrot.lane.b32.xlu0 %v2482_v39, %s2580_s1 }
0x21ad   :  { %v1584_v40 = vpop.permute.xlu0 %1583 }
0x21ae   :  { %v1586_v41 = vmul.f32 %v1584_v40, %v1569_v32 }
0x21b0   :  { %1588 = vrot.lane.b32.xlu1 %v1586_v41, %s2581_s17 }
0x2222   :  { %v1589_v42 = vpop.permute.xlu1 %1588 }
0x2223   :  { %2250 = vmatmul.mubr.msk.f32.vlgmr.msra.gmra.mrb[14].mxu1 %vm140_vm4, %v1589_v42 }
0x2224   :  { %2374 = vmatpush3.bf16.msra.mxu1 %v2849_v18  ;;  %2271 = vmatprep.mubr.msk.f32.mxu1 %vm2577_vm0, %v2578_v2 }
0x2225   :  { %2375 = vmatprep.subr.bf16.mxu1 %v2576_v1 }
0x2228   :  { %2377 = vmatpush3.bf16.msra.mxu1 %v2853_v21 }
0x22f6   :  { %v1658_v44 = vpop.f32.mrb[14].mxu1 }
0x22f7   :  { %v1662_v45 = vadd.f32 %v1658_v44, %v1064_v43  ;;  %v2251_v46 = vpop.f32.mrb[15].mxu1  ;;  %v1985_v43 = vld [vmem:[#allocation2] ss:$0 sm:$0xff] }
0x22f9   :  { %v1976_v47 = vmul.f32 -1.442695, %v1662_v45 }
0x22fb   :  { %2483 = vpow2.f32 %v1976_v47 }
0x2305   :  { %v2484_v48 = vpop.eup %2483 }
0x2306   :  { %v1666_v49 = vadd.f32 1.0, %v2484_v48 }
0x2308   :  { %2485 = vrcp.f32 %v1666_v49 }
0x2312   :  { %v2486_v50 = vpop.eup %2485 }
0x2313   :  { %v1669_v18 = vmul.f32 2.0, %v2486_v50 }
0x2315   :  { %v1977_v52 = vadd.f32 -1.0, %v1669_v18 }
0x2317   :  { %v1671_v2 = vsel %vm2715_vm3, %v1977_v52, %v2486_v50 }
0x2318   :  { %1674 = vrot.lane.b32.xlu0 %v1671_v2, %s2580_s1  ;;  %v1672_v60 = vmul.f32 %v1671_v2, %v1580_v37 }
0x238a   :  { %v1675_v1 = vpop.permute.xlu0 %1674 }
0x238b   :  { %v1677_v21 = vmul.f32 %v1675_v1, %v1671_v2 }
0x238d   :  { %1679 = vrot.lane.b32.xlu1 %v1677_v21, %s2581_s17 }
0x23ff   :  { %v1680_v38 = vpop.permute.xlu1 %1679 }
0x2400   :  { %v1682_v51 = vadd.f32 %v1680_v38, %v1672_v60 }
0x2402   :  { %2487 = vtanh.f32 %v1682_v51 }
0x240c   :  { %v2488_v53 = vpop.eup %2487 }
0x240d   :  { %1685 = vrot.lane.b32.xlu0 %v2488_v53, %s2580_s1 }
0x247f   :  { %v1686_v54 = vpop.permute.xlu0 %1685 }
0x2480   :  { %v1688_v55 = vmul.f32 %v1686_v54, %v1671_v2 }
0x2482   :  { %1690 = vrot.lane.b32.xlu1 %v1688_v55, %s2581_s17 }
0x24f4   :  { %v1691_v56 = vpop.permute.xlu1 %1690 }
0x24f5   :  { %2261 = vmatmul.mubr.msk.f32.vlgmr.msra.gmra.mrb[20].mxu0 %vm140_vm4, %v1691_v56 }
0x25c8   :  { %v1760_v58 = vpop.f32.mrb[20].mxu0 }
0x25c9   :  { %v1764_v9 = vadd.f32 %v1760_v58, %v1069_v28  ;;  %v2262_v59 = vpop.f32.mrb[21].mxu0 }
0x25cb   :  { %v1979_v12 = vmul.f32 -1.442695, %v1764_v9 }
0x25cd   :  { %2489 = vpow2.f32 %v1979_v12 }
0x25d7   :  { %v2490_v14 = vpop.eup %2489 }
0x25d8   :  { %v1768_v63 = vadd.f32 1.0, %v2490_v14 }
0x25da   :  { %2491 = vrcp.f32 %v1768_v63 }
0x25e4   :  { %v2492_v0 = vpop.eup %2491 }
0x25e5   :  { %v1771_v3 = vmul.f32 2.0, %v2492_v0 }
0x25e7   :  { %v1980_v4 = vadd.f32 -1.0, %v1771_v3 }
0x25e9   :  { %v1773_v5 = vsel %vm2715_vm3, %v1980_v4, %v2492_v0 }
0x25ea   :  { %1776 = vrot.lane.b32.xlu0 %v1773_v5, %s2580_s1  ;;  %v1774_v35 = vmul.f32 %v1773_v5, %v1682_v51 }
0x265c   :  { %v1777_v6 = vpop.permute.xlu0 %1776 }
0x265d   :  { %v1779_v8 = vmul.f32 %v1777_v6, %v1773_v5 }
0x265f   :  { %1781 = vrot.lane.b32.xlu1 %v1779_v8, %s2581_s17 }
0x26d1   :  { %v1782_v57 = vpop.permute.xlu1 %1781 }
0x26d2   :  { %v1784_v11 = vadd.f32 %v1782_v57, %v1774_v35 }
0x26d4   :  { %2493 = vtanh.f32 %v1784_v11 }
0x26de   :  { %v2494_v15 = vpop.eup %2493 }
0x26df   :  { %1787 = vrot.lane.b32.xlu0 %v2494_v15, %s2580_s1 }
0x2751   :  { %v1788_v16 = vpop.permute.xlu0 %1787 }
0x2752   :  { %v1790_v17 = vmul.f32 %v1788_v16, %v1773_v5 }
0x2754   :  { %1792 = vrot.lane.b32.xlu1 %v1790_v17, %s2581_s17 }
0x27c6   :  { %v1793_v19 = vpop.permute.xlu1 %1792 }
0x27c7   :  { %2272 = vmatmul.mubr.msk.f32.vlgmr.msra.gmra.mrb[16].mxu1 %vm140_vm4, %v1793_v19 }
0x289a   :  { %v1862_v13 = vpop.f32.mrb[16].mxu1 }
0x289b   :  { %v1866_v22 = vadd.f32 %v1862_v13, %v1074_v20  ;;  %v2273_v23 = vpop.f32.mrb[17].mxu1 }
0x289d   :  { %v1982_v24 = vmul.f32 -1.442695, %v1866_v22 }
0x289f   :  { %2495 = vpow2.f32 %v1982_v24 }
0x28a9   :  { %v2496_v61 = vpop.eup %2495 }
0x28aa   :  { %v1870_v25 = vadd.f32 1.0, %v2496_v61 }
0x28ac   :  { %2497 = vrcp.f32 %v1870_v25 }
0x28b6   :  { %v2498_v27 = vpop.eup %2497 }
0x28b7   :  { %v1873_v29 = vmul.f32 2.0, %v2498_v27 }
0x28b9   :  { %v1983_v30 = vadd.f32 -1.0, %v1873_v29 }
0x28bb   :  { %v1875_v31 = vsel %vm2715_vm3, %v1983_v30, %v2498_v27 }
0x28bc   :  { %1878 = vrot.lane.b32.xlu0 %v1875_v31, %s2580_s1  ;;  %v1876_v34 = vmul.f32 %v1875_v31, %v1784_v11 }
0x292e   :  { %v1879_v32 = vpop.permute.xlu0 %1878 }
0x292f   :  { %v1881_v10 = vmul.f32 %v1879_v32, %v1875_v31 }
0x2931   :  { %1883 = vrot.lane.b32.xlu1 %v1881_v10, %s2581_s17 }
0x2935   :  { %1899 = vrot.lane.b32.xlu1 %v1984_v7, %s2589_s21 }
0x29a3   :  { %v1884_v33 = vpop.permute.xlu1 %1883 }
0x29a4   :  { %v1886_v62 = vadd.f32 %v1884_v33, %v1876_v34 }
0x29a6   :  { %2499 = vtanh.f32 %v1886_v62 }
0x29a7   :  { %v1900_v37 = vpop.permute.xlu1 %1899 }
0x29b0   :  { %v2500_v36 = vpop.eup %2499 }
0x29b1   :  { %1889 = vrot.lane.b32.xlu0 %v2500_v36, %s2580_s1 }
0x2a23   :  { %v1890_v26 = vpop.permute.xlu0 %1889 }
0x2a24   :  { %v1892_v39 = vmul.f32 %v1890_v26, %v1875_v31 }
0x2a26   :  { %v1902_v40 = vmul.f32 %v1900_v37, %v1892_v39 }
0x2a28   :  { %1904 = vrot.lane.b32.xlu0 %v1902_v40, %s2581_s17 }
0x2a9a   :  { %v1905_v41 = vpop.permute.xlu0 %1904 }
0x2a9b   :  { %v1907_v42 = vsel %vm140_vm4, %v1905_v41, 0.0 }
0x2a9c   :  { %1908 = vadd.xlane.f32.xlu1 %v1907_v42 }
0x2b29   :  { %v1909_v44 = vpop.xlane.xlu1 %1908 }
0x2b2a   :  { %v1917_v45 = vadd.f32 %v1985_v43, %v1909_v44 }
0x2b2c   :  { %1919 = vst.msk [vmem:[%s3007_s7] sm:$0xff] %vm1918_vm5, %v1917_v45 }
0x2b2d   :  { %1924 = vsyncpa [#allocation4], 1 }
0x2b2e   :  { %1925 = vsyncpa [#allocation6], 1 }

</bundles_post_ra>
